<compile_context>
chip_gen: v7x
topology: tpu7x:2x2x1
jax: 0.10.0
libtpu: 0.0.40
codegen_flags: <defaults>
</compile_context>

<pallas_src>
import jax
import jax.numpy as jnp
from jax import lax
from jax.experimental import pallas as pl
from jax.experimental.pallas import tpu as pltpu


NEG_INF = -1e30  # finite additive mask value: avoids any inf-inf -> NaN risk


# ----------------------------- kernel helpers ------------------------------

def _layernorm(x, gamma, beta, eps=1e-5):
    mean = jnp.mean(x, axis=-1, keepdims=True)
    var = jnp.mean((x - mean) ** 2, axis=-1, keepdims=True)
    return (x - mean) * lax.rsqrt(var + eps) * gamma + beta


# ------------------------------ fused kernel -------------------------------

def make_forward_kernel(depth, heads, b, t, e, ff, max_pool):
    s = e // heads
    n = b * t
    # t is a multiple of 8 here, so the 2D<->3D reshapes below are copy-free
    # (sublane-aligned). Keep t padded to 8 if this ever changes.

    def kernel(x_ref, pos_ref, wa_ref, wb_ref, wc_ref, vec_ref,
               wo_ref, bo_ref, o_ref):
        # positional add (dropout p=0 -> identity); fold batch into M dim
        x3 = x_ref[...] + pos_ref[...][None, :, :]          # (b, t, e) f32
        x = x3.reshape(n, e)                                  # (b*t, e)

        # additive causal mask (diagonal kept), hoisted + pre-broadcast once
        row = lax.broadcasted_iota(jnp.int32, (t, t), 0)
        col = lax.broadcasted_iota(jnp.int32, (t, t), 1)
        mask_add = jnp.broadcast_to(
            jnp.where(col <= row, jnp.float32(0.0),
                      jnp.float32(NEG_INF))[None, :, :], (b, t, t))

        for d in range(depth):                       # static unrolled depth
            wa = wa_ref[d]                           # (e, qkv_pad)  bf16
            wbv = wb_ref[d]                          # (e+ff, e)     bf16
            wu, w2 = wbv[:e, :], wbv[e:, :]          # (e,e), (ff,e)
            w1 = wc_ref[d]                           # (e, ff)       bf16
            vt = vec_ref[d]                          # (8, ff)       f32
            bu, g1, be1 = vt[0:1, :e], vt[1:2, :e], vt[2:3, :e]
            b1 = vt[3:4, :]
            b2, g2, be2 = vt[4:5, :e], vt[5:6, :e], vt[6:7, :e]

            # --- fused QKV projection: one lane-dense matmul per block ---
            qkv = jnp.dot(x.astype(jnp.bfloat16), wa,
                          preferred_element_type=jnp.float32)  # (n, qkv_pad)
            qkv3 = qkv.reshape(b, t, qkv.shape[-1])             # (b, t, *)

            # --- per-head attention (unrolled), results kept in registers ---
            head_outs = []
            for h in range(heads):
                lo = h * s
                qh = qkv3[:, :, lo:lo + s].astype(jnp.bfloat16)
                kh = qkv3[:, :, e + lo:e + lo + s].astype(jnp.bfloat16)
                vh = qkv3[:, :, 2 * e + lo:2 * e + lo + s].astype(jnp.bfloat16)
                # 1/sqrt(s) is folded into wq host-side -> no scale here
                dot = jnp.einsum("bqs,bks->bqk", qh, kh,
                                 preferred_element_type=jnp.float32) + mask_add
                m = jnp.max(dot, axis=-1, keepdims=True)
                ex = jnp.exp(dot - m)
                inv = pl.reciprocal(jnp.sum(ex, axis=-1, keepdims=True),
                                    approx=True)
                p = (ex * inv).astype(jnp.bfloat16)
                head_outs.append(jnp.einsum(
                    "bqk,bks->bqs", p, vh,
                    preferred_element_type=jnp.float32))
            attn = jnp.concatenate(head_outs, axis=-1).reshape(n, e)

            # --- unify + residual + LN ---
            attn = jnp.dot(attn.astype(jnp.bfloat16), wu,
                           preferred_element_type=jnp.float32) + bu
            x = _layernorm(attn + x, g1, be1)

            # --- feed-forward + residual + LN ---
            hid = jnp.dot(x.astype(jnp.bfloat16), w1,
                          preferred_element_type=jnp.float32) + b1
            hid = jnp.maximum(hid, 0.0)
            ffo = jnp.dot(hid.astype(jnp.bfloat16), w2,
                          preferred_element_type=jnp.float32) + b2
            x = _layernorm(ffo + x, g2, be2)

        xb = x.reshape(b, t, e)
        pooled = jnp.max(xb, axis=1) if max_pool else jnp.mean(xb, axis=1)
        # lane-dense (padded) output store
        o_ref[...] = jnp.dot(pooled.astype(jnp.bfloat16), wo_ref[...],
                             preferred_element_type=jnp.float32) + bo_ref[...]

    return kernel


# ------------------------------ Python wrapper ------------------------------

def pack_params(params, heads, out_pad):
    """Host-side packing:
      wa   (depth, e, qkv_pad)  = [wq.T/sqrt(s) | wk.T | wv.T | 0-pad]  bf16
      wb   (depth, e+ff, e)     = rows [wu.T ; w2.T]                    bf16
      wc   (depth, e, ff)       = w1.T                                   bf16
      vecs (depth, 8, ff)       = rows [bu g1 be1 b1 b2 g2 be2 0]        f32
      wo   (e, out_pad), bo (1, out_pad)  (lane-dense padded)           bf16/f32
    """
    e = params["pos"].shape[1]
    blocks = params["blocks"]
    depth = len(blocks)
    ff = blocks[0]["w1"].shape[0]
    s = e // heads
    scale = 1.0 / (s ** 0.5)
    out_dim = params["wo"].shape[0]
    qkv_pad = max(((3 * e + 127) // 128) * 128, 3 * e)

    wa = jnp.zeros((depth, e, qkv_pad), jnp.float32)
    wb = jnp.zeros((depth, e + ff, e), jnp.float32)
    wc = jnp.zeros((depth, e, ff), jnp.float32)
    vecs = jnp.zeros((depth, 8, ff), jnp.float32)
    for d, p in enumerate(blocks):
        wa = wa.at[d, :, 0:e].set(p["wq"].T * scale)   # fold 1/sqrt(s)
        wa = wa.at[d, :, e:2 * e].set(p["wk"].T)
        wa = wa.at[d, :, 2 * e:3 * e].set(p["wv"].T)
        wb = wb.at[d, :e, :].set(p["wu"].T)
        wb = wb.at[d, e:, :].set(p["w2"].T)
        wc = wc.at[d].set(p["w1"].T)
        vecs = vecs.at[d, 0, :e].set(p["bu"][0])
        vecs = vecs.at[d, 1, :e].set(p["g1"][0])
        vecs = vecs.at[d, 2, :e].set(p["be1"][0])
        vecs = vecs.at[d, 3, :].set(p["b1"][0])
        vecs = vecs.at[d, 4, :e].set(p["b2"][0])
        vecs = vecs.at[d, 5, :e].set(p["g2"][0])
        vecs = vecs.at[d, 6, :e].set(p["be2"][0])

    wo_p = jnp.zeros((e, out_pad), jnp.float32).at[:, :out_dim].set(
        params["wo"].T)
    bo_p = jnp.zeros((1, out_pad), jnp.float32).at[:, :out_dim].set(
        params["bo"])
    return (wa.astype(jnp.bfloat16), wb.astype(jnp.bfloat16),
            wc.astype(jnp.bfloat16), vecs, wo_p.astype(jnp.bfloat16), bo_p)


def ts_reg_transformer_forward(x, params, heads, max_pool=True):
    b, t, e = x.shape
    depth = len(params["blocks"])
    ff = params["blocks"][0]["w1"].shape[0]
    out_dim = params["wo"].shape[0]
    out_pad = ((out_dim + 127) // 128) * 128            # lane-dense store
    wa, wb, wc, vecs, wo_p, bo_p = pack_params(params, heads, out_pad)
    kernel = make_forward_kernel(depth, heads, b, t, e, ff, max_pool)

    out = pl.pallas_call(
        kernel,
        out_shape=jax.ShapeDtypeStruct((b, out_pad), jnp.float32),
    )(x, params["pos"], wa, wb, wc, vecs, wo_p, bo_p)
    return out[:, :out_dim]


# ------------------------------ parameter init -----------------------------

def init_params(key, feature_dim, heads, depth, seq_length, out_dim):
    e, ff = feature_dim, 4 * feature_dim
    keys = jax.random.split(key, 2 + depth)
    params = {
        "pos": 0.1 * jax.random.normal(keys[0], (seq_length, e), jnp.float32),
        "wo": 0.1 * jax.random.normal(keys[1], (out_dim, e), jnp.float32),
        "bo": jnp.zeros((1, out_dim), jnp.float32),
        "blocks": [],
    }
    for d in range(depth):
        ks = jax.random.split(keys[2 + d], 8)
        params["blocks"].append({
            "wq": 0.1 * jax.random.normal(ks[0], (e, e), jnp.float32),
            "wk": 0.1 * jax.random.normal(ks[1], (e, e), jnp.float32),
            "wv": 0.1 * jax.random.normal(ks[2], (e, e), jnp.float32),
            "wu": 0.1 * jax.random.normal(ks[3], (e, e), jnp.float32),
            "bu": 0.01 * jax.random.normal(ks[4], (1, e), jnp.float32),
            "g1": jnp.ones((1, e), jnp.float32),
            "be1": jnp.zeros((1, e), jnp.float32),
            "w1": 0.1 * jax.random.normal(ks[5], (ff, e), jnp.float32),
            "b1": 0.01 * jax.random.normal(ks[6], (1, ff), jnp.float32),
            "w2": 0.1 * jax.random.normal(ks[7], (e, ff), jnp.float32),
            "b2": jnp.zeros((1, e), jnp.float32),
            "g2": jnp.ones((1, e), jnp.float32),
            "be2": jnp.zeros((1, e), jnp.float32),
        })
    return params


# ------------------------------ pure-JAX reference -------------------------

def _ref_ln(x, g, b, eps=1e-5):
    m = x.mean(-1, keepdims=True)
    v = ((x - m) ** 2).mean(-1, keepdims=True)
    return (x - m) / jnp.sqrt(v + eps) * g + b


def reference_forward(x, params, heads, max_pool=True):
    b, t, e = x.shape
    s = e // heads
    y = x + params["pos"][None]
    mask = jnp.tril(jnp.ones((t, t), bool))
    for p in params["blocks"]:
        q = (y @ p["wq"].T).reshape(b, t, heads, s)
        k = (y @ p["wk"].T).reshape(b, t, heads, s)
        v = (y @ p["wv"].T).reshape(b, t, heads, s)
        dot = jnp.einsum("bths,buhs->bhtu", q, k) / (s ** 0.5)
        dot = jnp.where(mask[None, None], dot, -jnp.inf)
        attn = jnp.einsum("bhtu,buhs->bths",
                          jax.nn.softmax(dot, axis=-1), v).reshape(b, t, e)
        attn = attn @ p["wu"].T + p["bu"]
        y = _ref_ln(attn + y, p["g1"], p["be1"])
        hid = jax.nn.relu(y @ p["w1"].T + p["b1"])
        y = _ref_ln(hid @ p["w2"].T + p["b2"] + y, p["g2"], p["be2"])
    pooled = jnp.max(y, axis=1) if max_pool else jnp.mean(y, axis=1)
    return pooled @ params["wo"].T + params["bo"]


# ----------------------------------- main -----------------------------------

if __name__ == "__main__":
    FEATURE_DIM, HEADS, DEPTH, SEQ_LEN, OUT_DIM = 32, 4, 2, 8, 4
    BATCH = 2

    key = jax.random.PRNGKey(0)
    k_x, k_p = jax.random.split(key)
    x = jax.random.normal(k_x, (BATCH, SEQ_LEN, FEATURE_DIM), jnp.float32)
    params = init_params(k_p, FEATURE_DIM, HEADS, DEPTH, SEQ_LEN, OUT_DIM)

    out = ts_reg_transformer_forward(x, params, HEADS, max_pool=True)
    out = jax.block_until_ready(out)

    ref = jax.block_until_ready(
        reference_forward(x, params, HEADS, max_pool=True))
    max_err = float(jnp.max(jnp.abs(out - ref)))
    assert out.shape == (BATCH, OUT_DIM), out.shape
    # tolerance absorbs bf16 MXU inputs + approx reciprocal softmax
    assert max_err < 5e-2, f"mismatch vs reference: {max_err}"

    print("KERNEL_OK")
</pallas_src>

<mosaic_0001>
module attributes {stable_mosaic.version = 11 : i64} {
  func.func @kernel(%arg0: memref<2x8x32xf32, #tpu.memory_space<vmem>>, %arg1: memref<8x32xf32, #tpu.memory_space<vmem>>, %arg2: memref<2x32x128xbf16, #tpu.memory_space<vmem>>, %arg3: memref<2x160x32xbf16, #tpu.memory_space<vmem>>, %arg4: memref<2x32x128xbf16, #tpu.memory_space<vmem>>, %arg5: memref<2x8x128xf32, #tpu.memory_space<vmem>>, %arg6: memref<32x128xbf16, #tpu.memory_space<vmem>>, %arg7: memref<1x128xf32, #tpu.memory_space<vmem>>, %arg8: memref<2x128xf32, #tpu.memory_space<vmem>>) attributes {dimension_semantics = [], scalar_prefetch = 0 : i64, scratch_operands = 0 : i64, tpu.core_type = #tpu.core_type<tc>} {
    %c0 = arith.constant 0 : index
    %c0_0 = arith.constant 0 : index
    %c0_1 = arith.constant 0 : index
    %0 = vector.load %arg0[%c0, %c0_0, %c0_1] : memref<2x8x32xf32, #tpu.memory_space<vmem>>, vector<2x8x32xf32>
    %c0_2 = arith.constant 0 : index
    %c0_3 = arith.constant 0 : index
    %1 = vector.load %arg1[%c0_2, %c0_3] : memref<8x32xf32, #tpu.memory_space<vmem>>, vector<8x32xf32>
    %2 = vector.shape_cast %1 : vector<8x32xf32> to vector<1x8x32xf32>
    %3 = vector.broadcast %2 : vector<1x8x32xf32> to vector<2x8x32xf32>
    %4 = arith.addf %0, %3 : vector<2x8x32xf32>
    %5 = vector.shape_cast %4 : vector<2x8x32xf32> to vector<16x32xf32>
    %6 = tpu.iota {dimensions = array<i32: 0>} : vector<8x8xi32>
    %7 = tpu.iota {dimensions = array<i32: 1>} : vector<8x8xi32>
    %8 = arith.cmpi sle, %7, %6 : vector<8x8xi32>
    %cst = arith.constant 0.000000e+00 : f32
    %cst_4 = arith.constant -1.000000e+30 : f32
    %9 = vector.broadcast %cst : f32 to vector<8x8xf32>
    %10 = vector.broadcast %cst_4 : f32 to vector<8x8xf32>
    %11 = arith.select %8, %9, %10 : vector<8x8xi1>, vector<8x8xf32>
    %12 = vector.shape_cast %11 : vector<8x8xf32> to vector<1x8x8xf32>
    %13 = vector.shape_cast %12 : vector<1x8x8xf32> to vector<1x8x8xf32>
    %14 = vector.broadcast %13 : vector<1x8x8xf32> to vector<2x8x8xf32>
    %c0_5 = arith.constant 0 : index
    %c0_6 = arith.constant 0 : index
    %c0_7 = arith.constant 0 : index
    %15 = vector.load %arg2[%c0_5, %c0_6, %c0_7] : memref<2x32x128xbf16, #tpu.memory_space<vmem>>, vector<1x32x128xbf16>
    %16 = vector.shape_cast %15 : vector<1x32x128xbf16> to vector<32x128xbf16>
    %c0_8 = arith.constant 0 : index
    %c0_9 = arith.constant 0 : index
    %c0_10 = arith.constant 0 : index
    %17 = vector.load %arg3[%c0_8, %c0_9, %c0_10] : memref<2x160x32xbf16, #tpu.memory_space<vmem>>, vector<1x160x32xbf16>
    %18 = vector.shape_cast %17 : vector<1x160x32xbf16> to vector<160x32xbf16>
    %19 = vector.extract_strided_slice %18 {offsets = [0, 0], sizes = [32, 32], strides = [1, 1]} : vector<160x32xbf16> to vector<32x32xbf16>
    %20 = vector.extract_strided_slice %18 {offsets = [32, 0], sizes = [128, 32], strides = [1, 1]} : vector<160x32xbf16> to vector<128x32xbf16>
    %c0_11 = arith.constant 0 : index
    %c0_12 = arith.constant 0 : index
    %c0_13 = arith.constant 0 : index
    %21 = vector.load %arg4[%c0_11, %c0_12, %c0_13] : memref<2x32x128xbf16, #tpu.memory_space<vmem>>, vector<1x32x128xbf16>
    %22 = vector.shape_cast %21 : vector<1x32x128xbf16> to vector<32x128xbf16>
    %c0_14 = arith.constant 0 : index
    %c0_15 = arith.constant 0 : index
    %c0_16 = arith.constant 0 : index
    %23 = vector.load %arg5[%c0_14, %c0_15, %c0_16] : memref<2x8x128xf32, #tpu.memory_space<vmem>>, vector<1x8x128xf32>
    %24 = vector.shape_cast %23 : vector<1x8x128xf32> to vector<8x128xf32>
    %25 = vector.extract_strided_slice %24 {offsets = [0, 0], sizes = [1, 32], strides = [1, 1]} : vector<8x128xf32> to vector<1x32xf32>
    %26 = vector.extract_strided_slice %24 {offsets = [1, 0], sizes = [1, 32], strides = [1, 1]} : vector<8x128xf32> to vector<1x32xf32>
    %27 = vector.extract_strided_slice %24 {offsets = [2, 0], sizes = [1, 32], strides = [1, 1]} : vector<8x128xf32> to vector<1x32xf32>
    %28 = vector.extract_strided_slice %24 {offsets = [3, 0], sizes = [1, 128], strides = [1, 1]} : vector<8x128xf32> to vector<1x128xf32>
    %29 = vector.extract_strided_slice %24 {offsets = [4, 0], sizes = [1, 32], strides = [1, 1]} : vector<8x128xf32> to vector<1x32xf32>
    %30 = vector.extract_strided_slice %24 {offsets = [5, 0], sizes = [1, 32], strides = [1, 1]} : vector<8x128xf32> to vector<1x32xf32>
    %31 = vector.extract_strided_slice %24 {offsets = [6, 0], sizes = [1, 32], strides = [1, 1]} : vector<8x128xf32> to vector<1x32xf32>
    %32 = arith.truncf %5 : vector<16x32xf32> to vector<16x32xbf16>
    %cst_17 = arith.constant dense<0.000000e+00> : vector<16x128xf32>
    %33 = tpu.matmul %32, %16, %cst_17 {dimension_numbers = #tpu.dot_dimension_numbers<[1], [0], [0], [1], [0, 0, 1, 1], [], []>} : vector<16x32xbf16>, vector<32x128xbf16>, vector<16x128xf32> -> vector<16x128xf32>
    %34 = vector.shape_cast %33 : vector<16x128xf32> to vector<2x8x128xf32>
    %35 = vector.extract_strided_slice %34 {offsets = [0, 0, 0], sizes = [2, 8, 8], strides = [1, 1, 1]} : vector<2x8x128xf32> to vector<2x8x8xf32>
    %36 = arith.truncf %35 : vector<2x8x8xf32> to vector<2x8x8xbf16>
    %37 = vector.extract_strided_slice %34 {offsets = [0, 0, 32], sizes = [2, 8, 8], strides = [1, 1, 1]} : vector<2x8x128xf32> to vector<2x8x8xf32>
    %38 = arith.truncf %37 : vector<2x8x8xf32> to vector<2x8x8xbf16>
    %39 = vector.extract_strided_slice %34 {offsets = [0, 0, 64], sizes = [2, 8, 8], strides = [1, 1, 1]} : vector<2x8x128xf32> to vector<2x8x8xf32>
    %40 = arith.truncf %39 : vector<2x8x8xf32> to vector<2x8x8xbf16>
    "tpu.trace_start"() <{level = 10 : i32, message = "bqs,bks->bqk"}> : () -> ()
    %cst_18 = arith.constant dense<0.000000e+00> : vector<2x8x8xf32>
    %41 = tpu.matmul %36, %38, %cst_18 {dimension_numbers = #tpu.dot_dimension_numbers<[2], [2], [1], [1], [0, 0, 0, 1, 1, 1], [0], [0]>} : vector<2x8x8xbf16>, vector<2x8x8xbf16>, vector<2x8x8xf32> -> vector<2x8x8xf32>
    "tpu.trace_stop"() : () -> ()
    %42 = arith.addf %41, %14 : vector<2x8x8xf32>
    %cst_19 = arith.constant dense<0xFF800000> : vector<2x8xf32>
    %43 = vector.multi_reduction <maximumf>, %42, %cst_19 [2] : vector<2x8x8xf32> to vector<2x8xf32>
    %44 = vector.shape_cast %43 : vector<2x8xf32> to vector<2x8x1xf32>
    %45 = vector.broadcast %44 : vector<2x8x1xf32> to vector<2x8x8xf32>
    %46 = arith.subf %42, %45 : vector<2x8x8xf32>
    %47 = math.exp %46 : vector<2x8x8xf32>
    %cst_20 = arith.constant dense<0.000000e+00> : vector<2x8xf32>
    %48 = vector.multi_reduction <add>, %47, %cst_20 [2] : vector<2x8x8xf32> to vector<2x8xf32>
    %49 = vector.shape_cast %48 : vector<2x8xf32> to vector<2x8x1xf32>
    %50 = tpu.reciprocal %49 {approx = true} : vector<2x8x1xf32> -> vector<2x8x1xf32>
    %51 = vector.broadcast %50 : vector<2x8x1xf32> to vector<2x8x8xf32>
    %52 = arith.mulf %47, %51 : vector<2x8x8xf32>
    %53 = arith.truncf %52 : vector<2x8x8xf32> to vector<2x8x8xbf16>
    "tpu.trace_start"() <{level = 10 : i32, message = "bqk,bks->bqs"}> : () -> ()
    %cst_21 = arith.constant dense<0.000000e+00> : vector<2x8x8xf32>
    %54 = tpu.matmul %53, %40, %cst_21 {dimension_numbers = #tpu.dot_dimension_numbers<[2], [1], [1], [2], [0, 0, 0, 1, 1, 2], [0], [0]>} : vector<2x8x8xbf16>, vector<2x8x8xbf16>, vector<2x8x8xf32> -> vector<2x8x8xf32>
    "tpu.trace_stop"() : () -> ()
    %55 = vector.extract_strided_slice %34 {offsets = [0, 0, 8], sizes = [2, 8, 8], strides = [1, 1, 1]} : vector<2x8x128xf32> to vector<2x8x8xf32>
    %56 = arith.truncf %55 : vector<2x8x8xf32> to vector<2x8x8xbf16>
    %57 = vector.extract_strided_slice %34 {offsets = [0, 0, 40], sizes = [2, 8, 8], strides = [1, 1, 1]} : vector<2x8x128xf32> to vector<2x8x8xf32>
    %58 = arith.truncf %57 : vector<2x8x8xf32> to vector<2x8x8xbf16>
    %59 = vector.extract_strided_slice %34 {offsets = [0, 0, 72], sizes = [2, 8, 8], strides = [1, 1, 1]} : vector<2x8x128xf32> to vector<2x8x8xf32>
    %60 = arith.truncf %59 : vector<2x8x8xf32> to vector<2x8x8xbf16>
    "tpu.trace_start"() <{level = 10 : i32, message = "bqs,bks->bqk"}> : () -> ()
    %cst_22 = arith.constant dense<0.000000e+00> : vector<2x8x8xf32>
    %61 = tpu.matmul %56, %58, %cst_22 {dimension_numbers = #tpu.dot_dimension_numbers<[2], [2], [1], [1], [0, 0, 0, 1, 1, 1], [0], [0]>} : vector<2x8x8xbf16>, vector<2x8x8xbf16>, vector<2x8x8xf32> -> vector<2x8x8xf32>
    "tpu.trace_stop"() : () -> ()
    %62 = arith.addf %61, %14 : vector<2x8x8xf32>
    %cst_23 = arith.constant dense<0xFF800000> : vector<2x8xf32>
    %63 = vector.multi_reduction <maximumf>, %62, %cst_23 [2] : vector<2x8x8xf32> to vector<2x8xf32>
    %64 = vector.shape_cast %63 : vector<2x8xf32> to vector<2x8x1xf32>
    %65 = vector.broadcast %64 : vector<2x8x1xf32> to vector<2x8x8xf32>
    %66 = arith.subf %62, %65 : vector<2x8x8xf32>
    %67 = math.exp %66 : vector<2x8x8xf32>
    %cst_24 = arith.constant dense<0.000000e+00> : vector<2x8xf32>
    %68 = vector.multi_reduction <add>, %67, %cst_24 [2] : vector<2x8x8xf32> to vector<2x8xf32>
    %69 = vector.shape_cast %68 : vector<2x8xf32> to vector<2x8x1xf32>
    %70 = tpu.reciprocal %69 {approx = true} : vector<2x8x1xf32> -> vector<2x8x1xf32>
    %71 = vector.broadcast %70 : vector<2x8x1xf32> to vector<2x8x8xf32>
    %72 = arith.mulf %67, %71 : vector<2x8x8xf32>
    %73 = arith.truncf %72 : vector<2x8x8xf32> to vector<2x8x8xbf16>
    "tpu.trace_start"() <{level = 10 : i32, message = "bqk,bks->bqs"}> : () -> ()
    %cst_25 = arith.constant dense<0.000000e+00> : vector<2x8x8xf32>
    %74 = tpu.matmul %73, %60, %cst_25 {dimension_numbers = #tpu.dot_dimension_numbers<[2], [1], [1], [2], [0, 0, 0, 1, 1, 2], [0], [0]>} : vector<2x8x8xbf16>, vector<2x8x8xbf16>, vector<2x8x8xf32> -> vector<2x8x8xf32>
    "tpu.trace_stop"() : () -> ()
    %75 = vector.extract_strided_slice %34 {offsets = [0, 0, 16], sizes = [2, 8, 8], strides = [1, 1, 1]} : vector<2x8x128xf32> to vector<2x8x8xf32>
    %76 = arith.truncf %75 : vector<2x8x8xf32> to vector<2x8x8xbf16>
    %77 = vector.extract_strided_slice %34 {offsets = [0, 0, 48], sizes = [2, 8, 8], strides = [1, 1, 1]} : vector<2x8x128xf32> to vector<2x8x8xf32>
    %78 = arith.truncf %77 : vector<2x8x8xf32> to vector<2x8x8xbf16>
    %79 = vector.extract_strided_slice %34 {offsets = [0, 0, 80], sizes = [2, 8, 8], strides = [1, 1, 1]} : vector<2x8x128xf32> to vector<2x8x8xf32>
    %80 = arith.truncf %79 : vector<2x8x8xf32> to vector<2x8x8xbf16>
    "tpu.trace_start"() <{level = 10 : i32, message = "bqs,bks->bqk"}> : () -> ()
    %cst_26 = arith.constant dense<0.000000e+00> : vector<2x8x8xf32>
    %81 = tpu.matmul %76, %78, %cst_26 {dimension_numbers = #tpu.dot_dimension_numbers<[2], [2], [1], [1], [0, 0, 0, 1, 1, 1], [0], [0]>} : vector<2x8x8xbf16>, vector<2x8x8xbf16>, vector<2x8x8xf32> -> vector<2x8x8xf32>
    "tpu.trace_stop"() : () -> ()
    %82 = arith.addf %81, %14 : vector<2x8x8xf32>
    %cst_27 = arith.constant dense<0xFF800000> : vector<2x8xf32>
    %83 = vector.multi_reduction <maximumf>, %82, %cst_27 [2] : vector<2x8x8xf32> to vector<2x8xf32>
    %84 = vector.shape_cast %83 : vector<2x8xf32> to vector<2x8x1xf32>
    %85 = vector.broadcast %84 : vector<2x8x1xf32> to vector<2x8x8xf32>
    %86 = arith.subf %82, %85 : vector<2x8x8xf32>
    %87 = math.exp %86 : vector<2x8x8xf32>
    %cst_28 = arith.constant dense<0.000000e+00> : vector<2x8xf32>
    %88 = vector.multi_reduction <add>, %87, %cst_28 [2] : vector<2x8x8xf32> to vector<2x8xf32>
    %89 = vector.shape_cast %88 : vector<2x8xf32> to vector<2x8x1xf32>
    %90 = tpu.reciprocal %89 {approx = true} : vector<2x8x1xf32> -> vector<2x8x1xf32>
    %91 = vector.broadcast %90 : vector<2x8x1xf32> to vector<2x8x8xf32>
    %92 = arith.mulf %87, %91 : vector<2x8x8xf32>
    %93 = arith.truncf %92 : vector<2x8x8xf32> to vector<2x8x8xbf16>
    "tpu.trace_start"() <{level = 10 : i32, message = "bqk,bks->bqs"}> : () -> ()
    %cst_29 = arith.constant dense<0.000000e+00> : vector<2x8x8xf32>
    %94 = tpu.matmul %93, %80, %cst_29 {dimension_numbers = #tpu.dot_dimension_numbers<[2], [1], [1], [2], [0, 0, 0, 1, 1, 2], [0], [0]>} : vector<2x8x8xbf16>, vector<2x8x8xbf16>, vector<2x8x8xf32> -> vector<2x8x8xf32>
    "tpu.trace_stop"() : () -> ()
    %95 = vector.extract_strided_slice %34 {offsets = [0, 0, 24], sizes = [2, 8, 8], strides = [1, 1, 1]} : vector<2x8x128xf32> to vector<2x8x8xf32>
    %96 = arith.truncf %95 : vector<2x8x8xf32> to vector<2x8x8xbf16>
    %97 = vector.extract_strided_slice %34 {offsets = [0, 0, 56], sizes = [2, 8, 8], strides = [1, 1, 1]} : vector<2x8x128xf32> to vector<2x8x8xf32>
    %98 = arith.truncf %97 : vector<2x8x8xf32> to vector<2x8x8xbf16>
    %99 = vector.extract_strided_slice %34 {offsets = [0, 0, 88], sizes = [2, 8, 8], strides = [1, 1, 1]} : vector<2x8x128xf32> to vector<2x8x8xf32>
    %100 = arith.truncf %99 : vector<2x8x8xf32> to vector<2x8x8xbf16>
    "tpu.trace_start"() <{level = 10 : i32, message = "bqs,bks->bqk"}> : () -> ()
    %cst_30 = arith.constant dense<0.000000e+00> : vector<2x8x8xf32>
    %101 = tpu.matmul %96, %98, %cst_30 {dimension_numbers = #tpu.dot_dimension_numbers<[2], [2], [1], [1], [0, 0, 0, 1, 1, 1], [0], [0]>} : vector<2x8x8xbf16>, vector<2x8x8xbf16>, vector<2x8x8xf32> -> vector<2x8x8xf32>
    "tpu.trace_stop"() : () -> ()
    %102 = arith.addf %101, %14 : vector<2x8x8xf32>
    %cst_31 = arith.constant dense<0xFF800000> : vector<2x8xf32>
    %103 = vector.multi_reduction <maximumf>, %102, %cst_31 [2] : vector<2x8x8xf32> to vector<2x8xf32>
    %104 = vector.shape_cast %103 : vector<2x8xf32> to vector<2x8x1xf32>
    %105 = vector.broadcast %104 : vector<2x8x1xf32> to vector<2x8x8xf32>
    %106 = arith.subf %102, %105 : vector<2x8x8xf32>
    %107 = math.exp %106 : vector<2x8x8xf32>
    %cst_32 = arith.constant dense<0.000000e+00> : vector<2x8xf32>
    %108 = vector.multi_reduction <add>, %107, %cst_32 [2] : vector<2x8x8xf32> to vector<2x8xf32>
    %109 = vector.shape_cast %108 : vector<2x8xf32> to vector<2x8x1xf32>
    %110 = tpu.reciprocal %109 {approx = true} : vector<2x8x1xf32> -> vector<2x8x1xf32>
    %111 = vector.broadcast %110 : vector<2x8x1xf32> to vector<2x8x8xf32>
    %112 = arith.mulf %107, %111 : vector<2x8x8xf32>
    %113 = arith.truncf %112 : vector<2x8x8xf32> to vector<2x8x8xbf16>
    "tpu.trace_start"() <{level = 10 : i32, message = "bqk,bks->bqs"}> : () -> ()
    %cst_33 = arith.constant dense<0.000000e+00> : vector<2x8x8xf32>
    %114 = tpu.matmul %113, %100, %cst_33 {dimension_numbers = #tpu.dot_dimension_numbers<[2], [1], [1], [2], [0, 0, 0, 1, 1, 2], [0], [0]>} : vector<2x8x8xbf16>, vector<2x8x8xbf16>, vector<2x8x8xf32> -> vector<2x8x8xf32>
    "tpu.trace_stop"() : () -> ()
    %115 = tpu.concatenate %54, %74, %94, %114 in 2 : vector<2x8x8xf32>, vector<2x8x8xf32>, vector<2x8x8xf32>, vector<2x8x8xf32> -> vector<2x8x32xf32>
    %116 = vector.shape_cast %115 : vector<2x8x32xf32> to vector<16x32xf32>
    %117 = arith.truncf %116 : vector<16x32xf32> to vector<16x32xbf16>
    %cst_34 = arith.constant dense<0.000000e+00> : vector<16x32xf32>
    %118 = tpu.matmul %117, %19, %cst_34 {dimension_numbers = #tpu.dot_dimension_numbers<[1], [0], [0], [1], [0, 0, 1, 1], [], []>} : vector<16x32xbf16>, vector<32x32xbf16>, vector<16x32xf32> -> vector<16x32xf32>
    %119 = vector.broadcast %25 : vector<1x32xf32> to vector<16x32xf32>
    %120 = arith.addf %118, %119 : vector<16x32xf32>
    %121 = arith.addf %120, %5 : vector<16x32xf32>
    %cst_35 = arith.constant dense<0.000000e+00> : vector<16xf32>
    %122 = vector.multi_reduction <add>, %121, %cst_35 [1] : vector<16x32xf32> to vector<16xf32>
    %123 = vector.shape_cast %122 : vector<16xf32> to vector<16x1xf32>
    %cst_36 = arith.constant 3.200000e+01 : f32
    %124 = vector.broadcast %cst_36 : f32 to vector<16x1xf32>
    %125 = arith.divf %123, %124 : vector<16x1xf32>
    %126 = vector.broadcast %125 : vector<16x1xf32> to vector<16x32xf32>
    %127 = arith.subf %121, %126 : vector<16x32xf32>
    %128 = arith.mulf %127, %127 : vector<16x32xf32>
    %cst_37 = arith.constant dense<0.000000e+00> : vector<16xf32>
    %129 = vector.multi_reduction <add>, %128, %cst_37 [1] : vector<16x32xf32> to vector<16xf32>
    %130 = vector.shape_cast %129 : vector<16xf32> to vector<16x1xf32>
    %cst_38 = arith.constant 3.200000e+01 : f32
    %131 = vector.broadcast %cst_38 : f32 to vector<16x1xf32>
    %132 = arith.divf %130, %131 : vector<16x1xf32>
    %133 = vector.broadcast %125 : vector<16x1xf32> to vector<16x32xf32>
    %134 = arith.subf %121, %133 : vector<16x32xf32>
    %cst_39 = arith.constant 9.99999974E-6 : f32
    %135 = vector.broadcast %cst_39 : f32 to vector<16x1xf32>
    %136 = arith.addf %132, %135 : vector<16x1xf32>
    %137 = math.rsqrt %136 : vector<16x1xf32>
    %138 = vector.broadcast %137 : vector<16x1xf32> to vector<16x32xf32>
    %139 = arith.mulf %134, %138 : vector<16x32xf32>
    %140 = vector.broadcast %26 : vector<1x32xf32> to vector<16x32xf32>
    %141 = arith.mulf %139, %140 : vector<16x32xf32>
    %142 = vector.broadcast %27 : vector<1x32xf32> to vector<16x32xf32>
    %143 = arith.addf %141, %142 : vector<16x32xf32>
    %144 = arith.truncf %143 : vector<16x32xf32> to vector<16x32xbf16>
    %cst_40 = arith.constant dense<0.000000e+00> : vector<16x128xf32>
    %145 = tpu.matmul %144, %22, %cst_40 {dimension_numbers = #tpu.dot_dimension_numbers<[1], [0], [0], [1], [0, 0, 1, 1], [], []>} : vector<16x32xbf16>, vector<32x128xbf16>, vector<16x128xf32> -> vector<16x128xf32>
    %146 = vector.broadcast %28 : vector<1x128xf32> to vector<16x128xf32>
    %147 = arith.addf %145, %146 : vector<16x128xf32>
    %cst_41 = arith.constant 0.000000e+00 : f32
    %148 = vector.broadcast %cst_41 : f32 to vector<16x128xf32>
    %149 = arith.maximumf %147, %148 : vector<16x128xf32>
    %150 = arith.truncf %149 : vector<16x128xf32> to vector<16x128xbf16>
    %cst_42 = arith.constant dense<0.000000e+00> : vector<16x32xf32>
    %151 = tpu.matmul %150, %20, %cst_42 {dimension_numbers = #tpu.dot_dimension_numbers<[1], [0], [0], [1], [0, 0, 1, 1], [], []>} : vector<16x128xbf16>, vector<128x32xbf16>, vector<16x32xf32> -> vector<16x32xf32>
    %152 = vector.broadcast %29 : vector<1x32xf32> to vector<16x32xf32>
    %153 = arith.addf %151, %152 : vector<16x32xf32>
    %154 = arith.addf %153, %143 : vector<16x32xf32>
    %cst_43 = arith.constant dense<0.000000e+00> : vector<16xf32>
    %155 = vector.multi_reduction <add>, %154, %cst_43 [1] : vector<16x32xf32> to vector<16xf32>
    %156 = vector.shape_cast %155 : vector<16xf32> to vector<16x1xf32>
    %cst_44 = arith.constant 3.200000e+01 : f32
    %157 = vector.broadcast %cst_44 : f32 to vector<16x1xf32>
    %158 = arith.divf %156, %157 : vector<16x1xf32>
    %159 = vector.broadcast %158 : vector<16x1xf32> to vector<16x32xf32>
    %160 = arith.subf %154, %159 : vector<16x32xf32>
    %161 = arith.mulf %160, %160 : vector<16x32xf32>
    %cst_45 = arith.constant dense<0.000000e+00> : vector<16xf32>
    %162 = vector.multi_reduction <add>, %161, %cst_45 [1] : vector<16x32xf32> to vector<16xf32>
    %163 = vector.shape_cast %162 : vector<16xf32> to vector<16x1xf32>
    %cst_46 = arith.constant 3.200000e+01 : f32
    %164 = vector.broadcast %cst_46 : f32 to vector<16x1xf32>
    %165 = arith.divf %163, %164 : vector<16x1xf32>
    %166 = vector.broadcast %158 : vector<16x1xf32> to vector<16x32xf32>
    %167 = arith.subf %154, %166 : vector<16x32xf32>
    %cst_47 = arith.constant 9.99999974E-6 : f32
    %168 = vector.broadcast %cst_47 : f32 to vector<16x1xf32>
    %169 = arith.addf %165, %168 : vector<16x1xf32>
    %170 = math.rsqrt %169 : vector<16x1xf32>
    %171 = vector.broadcast %170 : vector<16x1xf32> to vector<16x32xf32>
    %172 = arith.mulf %167, %171 : vector<16x32xf32>
    %173 = vector.broadcast %30 : vector<1x32xf32> to vector<16x32xf32>
    %174 = arith.mulf %172, %173 : vector<16x32xf32>
    %175 = vector.broadcast %31 : vector<1x32xf32> to vector<16x32xf32>
    %176 = arith.addf %174, %175 : vector<16x32xf32>
    %c1 = arith.constant 1 : index
    %c0_48 = arith.constant 0 : index
    %c0_49 = arith.constant 0 : index
    %177 = vector.load %arg2[%c1, %c0_48, %c0_49] : memref<2x32x128xbf16, #tpu.memory_space<vmem>>, vector<1x32x128xbf16>
    %178 = vector.shape_cast %177 : vector<1x32x128xbf16> to vector<32x128xbf16>
    %c1_50 = arith.constant 1 : index
    %c0_51 = arith.constant 0 : index
    %c0_52 = arith.constant 0 : index
    %179 = vector.load %arg3[%c1_50, %c0_51, %c0_52] : memref<2x160x32xbf16, #tpu.memory_space<vmem>>, vector<1x160x32xbf16>
    %180 = vector.shape_cast %179 : vector<1x160x32xbf16> to vector<160x32xbf16>
    %181 = vector.extract_strided_slice %180 {offsets = [0, 0], sizes = [32, 32], strides = [1, 1]} : vector<160x32xbf16> to vector<32x32xbf16>
    %182 = vector.extract_strided_slice %180 {offsets = [32, 0], sizes = [128, 32], strides = [1, 1]} : vector<160x32xbf16> to vector<128x32xbf16>
    %c1_53 = arith.constant 1 : index
    %c0_54 = arith.constant 0 : index
    %c0_55 = arith.constant 0 : index
    %183 = vector.load %arg4[%c1_53, %c0_54, %c0_55] : memref<2x32x128xbf16, #tpu.memory_space<vmem>>, vector<1x32x128xbf16>
    %184 = vector.shape_cast %183 : vector<1x32x128xbf16> to vector<32x128xbf16>
    %c1_56 = arith.constant 1 : index
    %c0_57 = arith.constant 0 : index
    %c0_58 = arith.constant 0 : index
    %185 = vector.load %arg5[%c1_56, %c0_57, %c0_58] : memref<2x8x128xf32, #tpu.memory_space<vmem>>, vector<1x8x128xf32>
    %186 = vector.shape_cast %185 : vector<1x8x128xf32> to vector<8x128xf32>
    %187 = vector.extract_strided_slice %186 {offsets = [0, 0], sizes = [1, 32], strides = [1, 1]} : vector<8x128xf32> to vector<1x32xf32>
    %188 = vector.extract_strided_slice %186 {offsets = [1, 0], sizes = [1, 32], strides = [1, 1]} : vector<8x128xf32> to vector<1x32xf32>
    %189 = vector.extract_strided_slice %186 {offsets = [2, 0], sizes = [1, 32], strides = [1, 1]} : vector<8x128xf32> to vector<1x32xf32>
    %190 = vector.extract_strided_slice %186 {offsets = [3, 0], sizes = [1, 128], strides = [1, 1]} : vector<8x128xf32> to vector<1x128xf32>
    %191 = vector.extract_strided_slice %186 {offsets = [4, 0], sizes = [1, 32], strides = [1, 1]} : vector<8x128xf32> to vector<1x32xf32>
    %192 = vector.extract_strided_slice %186 {offsets = [5, 0], sizes = [1, 32], strides = [1, 1]} : vector<8x128xf32> to vector<1x32xf32>
    %193 = vector.extract_strided_slice %186 {offsets = [6, 0], sizes = [1, 32], strides = [1, 1]} : vector<8x128xf32> to vector<1x32xf32>
    %194 = arith.truncf %176 : vector<16x32xf32> to vector<16x32xbf16>
    %cst_59 = arith.constant dense<0.000000e+00> : vector<16x128xf32>
    %195 = tpu.matmul %194, %178, %cst_59 {dimension_numbers = #tpu.dot_dimension_numbers<[1], [0], [0], [1], [0, 0, 1, 1], [], []>} : vector<16x32xbf16>, vector<32x128xbf16>, vector<16x128xf32> -> vector<16x128xf32>
    %196 = vector.shape_cast %195 : vector<16x128xf32> to vector<2x8x128xf32>
    %197 = vector.extract_strided_slice %196 {offsets = [0, 0, 0], sizes = [2, 8, 8], strides = [1, 1, 1]} : vector<2x8x128xf32> to vector<2x8x8xf32>
    %198 = arith.truncf %197 : vector<2x8x8xf32> to vector<2x8x8xbf16>
    %199 = vector.extract_strided_slice %196 {offsets = [0, 0, 32], sizes = [2, 8, 8], strides = [1, 1, 1]} : vector<2x8x128xf32> to vector<2x8x8xf32>
    %200 = arith.truncf %199 : vector<2x8x8xf32> to vector<2x8x8xbf16>
    %201 = vector.extract_strided_slice %196 {offsets = [0, 0, 64], sizes = [2, 8, 8], strides = [1, 1, 1]} : vector<2x8x128xf32> to vector<2x8x8xf32>
    %202 = arith.truncf %201 : vector<2x8x8xf32> to vector<2x8x8xbf16>
    "tpu.trace_start"() <{level = 10 : i32, message = "bqs,bks->bqk"}> : () -> ()
    %cst_60 = arith.constant dense<0.000000e+00> : vector<2x8x8xf32>
    %203 = tpu.matmul %198, %200, %cst_60 {dimension_numbers = #tpu.dot_dimension_numbers<[2], [2], [1], [1], [0, 0, 0, 1, 1, 1], [0], [0]>} : vector<2x8x8xbf16>, vector<2x8x8xbf16>, vector<2x8x8xf32> -> vector<2x8x8xf32>
    "tpu.trace_stop"() : () -> ()
    %204 = arith.addf %203, %14 : vector<2x8x8xf32>
    %cst_61 = arith.constant dense<0xFF800000> : vector<2x8xf32>
    %205 = vector.multi_reduction <maximumf>, %204, %cst_61 [2] : vector<2x8x8xf32> to vector<2x8xf32>
    %206 = vector.shape_cast %205 : vector<2x8xf32> to vector<2x8x1xf32>
    %207 = vector.broadcast %206 : vector<2x8x1xf32> to vector<2x8x8xf32>
    %208 = arith.subf %204, %207 : vector<2x8x8xf32>
    %209 = math.exp %208 : vector<2x8x8xf32>
    %cst_62 = arith.constant dense<0.000000e+00> : vector<2x8xf32>
    %210 = vector.multi_reduction <add>, %209, %cst_62 [2] : vector<2x8x8xf32> to vector<2x8xf32>
    %211 = vector.shape_cast %210 : vector<2x8xf32> to vector<2x8x1xf32>
    %212 = tpu.reciprocal %211 {approx = true} : vector<2x8x1xf32> -> vector<2x8x1xf32>
    %213 = vector.broadcast %212 : vector<2x8x1xf32> to vector<2x8x8xf32>
    %214 = arith.mulf %209, %213 : vector<2x8x8xf32>
    %215 = arith.truncf %214 : vector<2x8x8xf32> to vector<2x8x8xbf16>
    "tpu.trace_start"() <{level = 10 : i32, message = "bqk,bks->bqs"}> : () -> ()
    %cst_63 = arith.constant dense<0.000000e+00> : vector<2x8x8xf32>
    %216 = tpu.matmul %215, %202, %cst_63 {dimension_numbers = #tpu.dot_dimension_numbers<[2], [1], [1], [2], [0, 0, 0, 1, 1, 2], [0], [0]>} : vector<2x8x8xbf16>, vector<2x8x8xbf16>, vector<2x8x8xf32> -> vector<2x8x8xf32>
    "tpu.trace_stop"() : () -> ()
    %217 = vector.extract_strided_slice %196 {offsets = [0, 0, 8], sizes = [2, 8, 8], strides = [1, 1, 1]} : vector<2x8x128xf32> to vector<2x8x8xf32>
    %218 = arith.truncf %217 : vector<2x8x8xf32> to vector<2x8x8xbf16>
    %219 = vector.extract_strided_slice %196 {offsets = [0, 0, 40], sizes = [2, 8, 8], strides = [1, 1, 1]} : vector<2x8x128xf32> to vector<2x8x8xf32>
    %220 = arith.truncf %219 : vector<2x8x8xf32> to vector<2x8x8xbf16>
    %221 = vector.extract_strided_slice %196 {offsets = [0, 0, 72], sizes = [2, 8, 8], strides = [1, 1, 1]} : vector<2x8x128xf32> to vector<2x8x8xf32>
    %222 = arith.truncf %221 : vector<2x8x8xf32> to vector<2x8x8xbf16>
    "tpu.trace_start"() <{level = 10 : i32, message = "bqs,bks->bqk"}> : () -> ()
    %cst_64 = arith.constant dense<0.000000e+00> : vector<2x8x8xf32>
    %223 = tpu.matmul %218, %220, %cst_64 {dimension_numbers = #tpu.dot_dimension_numbers<[2], [2], [1], [1], [0, 0, 0, 1, 1, 1], [0], [0]>} : vector<2x8x8xbf16>, vector<2x8x8xbf16>, vector<2x8x8xf32> -> vector<2x8x8xf32>
    "tpu.trace_stop"() : () -> ()
    %224 = arith.addf %223, %14 : vector<2x8x8xf32>
    %cst_65 = arith.constant dense<0xFF800000> : vector<2x8xf32>
    %225 = vector.multi_reduction <maximumf>, %224, %cst_65 [2] : vector<2x8x8xf32> to vector<2x8xf32>
    %226 = vector.shape_cast %225 : vector<2x8xf32> to vector<2x8x1xf32>
    %227 = vector.broadcast %226 : vector<2x8x1xf32> to vector<2x8x8xf32>
    %228 = arith.subf %224, %227 : vector<2x8x8xf32>
    %229 = math.exp %228 : vector<2x8x8xf32>
    %cst_66 = arith.constant dense<0.000000e+00> : vector<2x8xf32>
    %230 = vector.multi_reduction <add>, %229, %cst_66 [2] : vector<2x8x8xf32> to vector<2x8xf32>
    %231 = vector.shape_cast %230 : vector<2x8xf32> to vector<2x8x1xf32>
    %232 = tpu.reciprocal %231 {approx = true} : vector<2x8x1xf32> -> vector<2x8x1xf32>
    %233 = vector.broadcast %232 : vector<2x8x1xf32> to vector<2x8x8xf32>
    %234 = arith.mulf %229, %233 : vector<2x8x8xf32>
    %235 = arith.truncf %234 : vector<2x8x8xf32> to vector<2x8x8xbf16>
    "tpu.trace_start"() <{level = 10 : i32, message = "bqk,bks->bqs"}> : () -> ()
    %cst_67 = arith.constant dense<0.000000e+00> : vector<2x8x8xf32>
    %236 = tpu.matmul %235, %222, %cst_67 {dimension_numbers = #tpu.dot_dimension_numbers<[2], [1], [1], [2], [0, 0, 0, 1, 1, 2], [0], [0]>} : vector<2x8x8xbf16>, vector<2x8x8xbf16>, vector<2x8x8xf32> -> vector<2x8x8xf32>
    "tpu.trace_stop"() : () -> ()
    %237 = vector.extract_strided_slice %196 {offsets = [0, 0, 16], sizes = [2, 8, 8], strides = [1, 1, 1]} : vector<2x8x128xf32> to vector<2x8x8xf32>
    %238 = arith.truncf %237 : vector<2x8x8xf32> to vector<2x8x8xbf16>
    %239 = vector.extract_strided_slice %196 {offsets = [0, 0, 48], sizes = [2, 8, 8], strides = [1, 1, 1]} : vector<2x8x128xf32> to vector<2x8x8xf32>
    %240 = arith.truncf %239 : vector<2x8x8xf32> to vector<2x8x8xbf16>
    %241 = vector.extract_strided_slice %196 {offsets = [0, 0, 80], sizes = [2, 8, 8], strides = [1, 1, 1]} : vector<2x8x128xf32> to vector<2x8x8xf32>
    %242 = arith.truncf %241 : vector<2x8x8xf32> to vector<2x8x8xbf16>
    "tpu.trace_start"() <{level = 10 : i32, message = "bqs,bks->bqk"}> : () -> ()
    %cst_68 = arith.constant dense<0.000000e+00> : vector<2x8x8xf32>
    %243 = tpu.matmul %238, %240, %cst_68 {dimension_numbers = #tpu.dot_dimension_numbers<[2], [2], [1], [1], [0, 0, 0, 1, 1, 1], [0], [0]>} : vector<2x8x8xbf16>, vector<2x8x8xbf16>, vector<2x8x8xf32> -> vector<2x8x8xf32>
    "tpu.trace_stop"() : () -> ()
    %244 = arith.addf %243, %14 : vector<2x8x8xf32>
    %cst_69 = arith.constant dense<0xFF800000> : vector<2x8xf32>
    %245 = vector.multi_reduction <maximumf>, %244, %cst_69 [2] : vector<2x8x8xf32> to vector<2x8xf32>
    %246 = vector.shape_cast %245 : vector<2x8xf32> to vector<2x8x1xf32>
    %247 = vector.broadcast %246 : vector<2x8x1xf32> to vector<2x8x8xf32>
    %248 = arith.subf %244, %247 : vector<2x8x8xf32>
    %249 = math.exp %248 : vector<2x8x8xf32>
    %cst_70 = arith.constant dense<0.000000e+00> : vector<2x8xf32>
    %250 = vector.multi_reduction <add>, %249, %cst_70 [2] : vector<2x8x8xf32> to vector<2x8xf32>
    %251 = vector.shape_cast %250 : vector<2x8xf32> to vector<2x8x1xf32>
    %252 = tpu.reciprocal %251 {approx = true} : vector<2x8x1xf32> -> vector<2x8x1xf32>
    %253 = vector.broadcast %252 : vector<2x8x1xf32> to vector<2x8x8xf32>
    %254 = arith.mulf %249, %253 : vector<2x8x8xf32>
    %255 = arith.truncf %254 : vector<2x8x8xf32> to vector<2x8x8xbf16>
    "tpu.trace_start"() <{level = 10 : i32, message = "bqk,bks->bqs"}> : () -> ()
    %cst_71 = arith.constant dense<0.000000e+00> : vector<2x8x8xf32>
    %256 = tpu.matmul %255, %242, %cst_71 {dimension_numbers = #tpu.dot_dimension_numbers<[2], [1], [1], [2], [0, 0, 0, 1, 1, 2], [0], [0]>} : vector<2x8x8xbf16>, vector<2x8x8xbf16>, vector<2x8x8xf32> -> vector<2x8x8xf32>
    "tpu.trace_stop"() : () -> ()
    %257 = vector.extract_strided_slice %196 {offsets = [0, 0, 24], sizes = [2, 8, 8], strides = [1, 1, 1]} : vector<2x8x128xf32> to vector<2x8x8xf32>
    %258 = arith.truncf %257 : vector<2x8x8xf32> to vector<2x8x8xbf16>
    %259 = vector.extract_strided_slice %196 {offsets = [0, 0, 56], sizes = [2, 8, 8], strides = [1, 1, 1]} : vector<2x8x128xf32> to vector<2x8x8xf32>
    %260 = arith.truncf %259 : vector<2x8x8xf32> to vector<2x8x8xbf16>
    %261 = vector.extract_strided_slice %196 {offsets = [0, 0, 88], sizes = [2, 8, 8], strides = [1, 1, 1]} : vector<2x8x128xf32> to vector<2x8x8xf32>
    %262 = arith.truncf %261 : vector<2x8x8xf32> to vector<2x8x8xbf16>
    "tpu.trace_start"() <{level = 10 : i32, message = "bqs,bks->bqk"}> : () -> ()
    %cst_72 = arith.constant dense<0.000000e+00> : vector<2x8x8xf32>
    %263 = tpu.matmul %258, %260, %cst_72 {dimension_numbers = #tpu.dot_dimension_numbers<[2], [2], [1], [1], [0, 0, 0, 1, 1, 1], [0], [0]>} : vector<2x8x8xbf16>, vector<2x8x8xbf16>, vector<2x8x8xf32> -> vector<2x8x8xf32>
    "tpu.trace_stop"() : () -> ()
    %264 = arith.addf %263, %14 : vector<2x8x8xf32>
    %cst_73 = arith.constant dense<0xFF800000> : vector<2x8xf32>
    %265 = vector.multi_reduction <maximumf>, %264, %cst_73 [2] : vector<2x8x8xf32> to vector<2x8xf32>
    %266 = vector.shape_cast %265 : vector<2x8xf32> to vector<2x8x1xf32>
    %267 = vector.broadcast %266 : vector<2x8x1xf32> to vector<2x8x8xf32>
    %268 = arith.subf %264, %267 : vector<2x8x8xf32>
    %269 = math.exp %268 : vector<2x8x8xf32>
    %cst_74 = arith.constant dense<0.000000e+00> : vector<2x8xf32>
    %270 = vector.multi_reduction <add>, %269, %cst_74 [2] : vector<2x8x8xf32> to vector<2x8xf32>
    %271 = vector.shape_cast %270 : vector<2x8xf32> to vector<2x8x1xf32>
    %272 = tpu.reciprocal %271 {approx = true} : vector<2x8x1xf32> -> vector<2x8x1xf32>
    %273 = vector.broadcast %272 : vector<2x8x1xf32> to vector<2x8x8xf32>
    %274 = arith.mulf %269, %273 : vector<2x8x8xf32>
    %275 = arith.truncf %274 : vector<2x8x8xf32> to vector<2x8x8xbf16>
    "tpu.trace_start"() <{level = 10 : i32, message = "bqk,bks->bqs"}> : () -> ()
    %cst_75 = arith.constant dense<0.000000e+00> : vector<2x8x8xf32>
    %276 = tpu.matmul %275, %262, %cst_75 {dimension_numbers = #tpu.dot_dimension_numbers<[2], [1], [1], [2], [0, 0, 0, 1, 1, 2], [0], [0]>} : vector<2x8x8xbf16>, vector<2x8x8xbf16>, vector<2x8x8xf32> -> vector<2x8x8xf32>
    "tpu.trace_stop"() : () -> ()
    %277 = tpu.concatenate %216, %236, %256, %276 in 2 : vector<2x8x8xf32>, vector<2x8x8xf32>, vector<2x8x8xf32>, vector<2x8x8xf32> -> vector<2x8x32xf32>
    %278 = vector.shape_cast %277 : vector<2x8x32xf32> to vector<16x32xf32>
    %279 = arith.truncf %278 : vector<16x32xf32> to vector<16x32xbf16>
    %cst_76 = arith.constant dense<0.000000e+00> : vector<16x32xf32>
    %280 = tpu.matmul %279, %181, %cst_76 {dimension_numbers = #tpu.dot_dimension_numbers<[1], [0], [0], [1], [0, 0, 1, 1], [], []>} : vector<16x32xbf16>, vector<32x32xbf16>, vector<16x32xf32> -> vector<16x32xf32>
    %281 = vector.broadcast %187 : vector<1x32xf32> to vector<16x32xf32>
    %282 = arith.addf %280, %281 : vector<16x32xf32>
    %283 = arith.addf %282, %176 : vector<16x32xf32>
    %cst_77 = arith.constant dense<0.000000e+00> : vector<16xf32>
    %284 = vector.multi_reduction <add>, %283, %cst_77 [1] : vector<16x32xf32> to vector<16xf32>
    %285 = vector.shape_cast %284 : vector<16xf32> to vector<16x1xf32>
    %cst_78 = arith.constant 3.200000e+01 : f32
    %286 = vector.broadcast %cst_78 : f32 to vector<16x1xf32>
    %287 = arith.divf %285, %286 : vector<16x1xf32>
    %288 = vector.broadcast %287 : vector<16x1xf32> to vector<16x32xf32>
    %289 = arith.subf %283, %288 : vector<16x32xf32>
    %290 = arith.mulf %289, %289 : vector<16x32xf32>
    %cst_79 = arith.constant dense<0.000000e+00> : vector<16xf32>
    %291 = vector.multi_reduction <add>, %290, %cst_79 [1] : vector<16x32xf32> to vector<16xf32>
    %292 = vector.shape_cast %291 : vector<16xf32> to vector<16x1xf32>
    %cst_80 = arith.constant 3.200000e+01 : f32
    %293 = vector.broadcast %cst_80 : f32 to vector<16x1xf32>
    %294 = arith.divf %292, %293 : vector<16x1xf32>
    %295 = vector.broadcast %287 : vector<16x1xf32> to vector<16x32xf32>
    %296 = arith.subf %283, %295 : vector<16x32xf32>
    %cst_81 = arith.constant 9.99999974E-6 : f32
    %297 = vector.broadcast %cst_81 : f32 to vector<16x1xf32>
    %298 = arith.addf %294, %297 : vector<16x1xf32>
    %299 = math.rsqrt %298 : vector<16x1xf32>
    %300 = vector.broadcast %299 : vector<16x1xf32> to vector<16x32xf32>
    %301 = arith.mulf %296, %300 : vector<16x32xf32>
    %302 = vector.broadcast %188 : vector<1x32xf32> to vector<16x32xf32>
    %303 = arith.mulf %301, %302 : vector<16x32xf32>
    %304 = vector.broadcast %189 : vector<1x32xf32> to vector<16x32xf32>
    %305 = arith.addf %303, %304 : vector<16x32xf32>
    %306 = arith.truncf %305 : vector<16x32xf32> to vector<16x32xbf16>
    %cst_82 = arith.constant dense<0.000000e+00> : vector<16x128xf32>
    %307 = tpu.matmul %306, %184, %cst_82 {dimension_numbers = #tpu.dot_dimension_numbers<[1], [0], [0], [1], [0, 0, 1, 1], [], []>} : vector<16x32xbf16>, vector<32x128xbf16>, vector<16x128xf32> -> vector<16x128xf32>
    %308 = vector.broadcast %190 : vector<1x128xf32> to vector<16x128xf32>
    %309 = arith.addf %307, %308 : vector<16x128xf32>
    %cst_83 = arith.constant 0.000000e+00 : f32
    %310 = vector.broadcast %cst_83 : f32 to vector<16x128xf32>
    %311 = arith.maximumf %309, %310 : vector<16x128xf32>
    %312 = arith.truncf %311 : vector<16x128xf32> to vector<16x128xbf16>
    %cst_84 = arith.constant dense<0.000000e+00> : vector<16x32xf32>
    %313 = tpu.matmul %312, %182, %cst_84 {dimension_numbers = #tpu.dot_dimension_numbers<[1], [0], [0], [1], [0, 0, 1, 1], [], []>} : vector<16x128xbf16>, vector<128x32xbf16>, vector<16x32xf32> -> vector<16x32xf32>
    %314 = vector.broadcast %191 : vector<1x32xf32> to vector<16x32xf32>
    %315 = arith.addf %313, %314 : vector<16x32xf32>
    %316 = arith.addf %315, %305 : vector<16x32xf32>
    %cst_85 = arith.constant dense<0.000000e+00> : vector<16xf32>
    %317 = vector.multi_reduction <add>, %316, %cst_85 [1] : vector<16x32xf32> to vector<16xf32>
    %318 = vector.shape_cast %317 : vector<16xf32> to vector<16x1xf32>
    %cst_86 = arith.constant 3.200000e+01 : f32
    %319 = vector.broadcast %cst_86 : f32 to vector<16x1xf32>
    %320 = arith.divf %318, %319 : vector<16x1xf32>
    %321 = vector.broadcast %320 : vector<16x1xf32> to vector<16x32xf32>
    %322 = arith.subf %316, %321 : vector<16x32xf32>
    %323 = arith.mulf %322, %322 : vector<16x32xf32>
    %cst_87 = arith.constant dense<0.000000e+00> : vector<16xf32>
    %324 = vector.multi_reduction <add>, %323, %cst_87 [1] : vector<16x32xf32> to vector<16xf32>
    %325 = vector.shape_cast %324 : vector<16xf32> to vector<16x1xf32>
    %cst_88 = arith.constant 3.200000e+01 : f32
    %326 = vector.broadcast %cst_88 : f32 to vector<16x1xf32>
    %327 = arith.divf %325, %326 : vector<16x1xf32>
    %328 = vector.broadcast %320 : vector<16x1xf32> to vector<16x32xf32>
    %329 = arith.subf %316, %328 : vector<16x32xf32>
    %cst_89 = arith.constant 9.99999974E-6 : f32
    %330 = vector.broadcast %cst_89 : f32 to vector<16x1xf32>
    %331 = arith.addf %327, %330 : vector<16x1xf32>
    %332 = math.rsqrt %331 : vector<16x1xf32>
    %333 = vector.broadcast %332 : vector<16x1xf32> to vector<16x32xf32>
    %334 = arith.mulf %329, %333 : vector<16x32xf32>
    %335 = vector.broadcast %192 : vector<1x32xf32> to vector<16x32xf32>
    %336 = arith.mulf %334, %335 : vector<16x32xf32>
    %337 = vector.broadcast %193 : vector<1x32xf32> to vector<16x32xf32>
    %338 = arith.addf %336, %337 : vector<16x32xf32>
    %339 = vector.shape_cast %338 : vector<16x32xf32> to vector<2x8x32xf32>
    %cst_90 = arith.constant dense<0xFF800000> : vector<2x32xf32>
    %340 = vector.multi_reduction <maximumf>, %339, %cst_90 [1] : vector<2x8x32xf32> to vector<2x32xf32>
    %341 = arith.truncf %340 : vector<2x32xf32> to vector<2x32xbf16>
    %c0_91 = arith.constant 0 : index
    %c0_92 = arith.constant 0 : index
    %342 = vector.load %arg6[%c0_91, %c0_92] : memref<32x128xbf16, #tpu.memory_space<vmem>>, vector<32x128xbf16>
    %cst_93 = arith.constant dense<0.000000e+00> : vector<2x128xf32>
    %343 = tpu.matmul %341, %342, %cst_93 {dimension_numbers = #tpu.dot_dimension_numbers<[1], [0], [0], [1], [0, 0, 1, 1], [], []>} : vector<2x32xbf16>, vector<32x128xbf16>, vector<2x128xf32> -> vector<2x128xf32>
    %c0_94 = arith.constant 0 : index
    %c0_95 = arith.constant 0 : index
    %344 = vector.load %arg7[%c0_94, %c0_95] : memref<1x128xf32, #tpu.memory_space<vmem>>, vector<1x128xf32>
    %345 = vector.broadcast %344 : vector<1x128xf32> to vector<2x128xf32>
    %346 = arith.addf %343, %345 : vector<2x128xf32>
    %c0_96 = arith.constant 0 : index
    %c0_97 = arith.constant 0 : index
    %347 = vector.load %arg8[%c0_96, %c0_97] : memref<2x128xf32, #tpu.memory_space<vmem>>, vector<2x128xf32>
    tpu.vector_store %arg8[%c0_96, %c0_97], %346 {strides = array<i32>} : memref<2x128xf32, #tpu.memory_space<vmem>>, vector<2x128xf32>,
    return
  }
}

</mosaic_0001>

<bundles_post_ra>
// kernel: tpu_custom_call.1
= control target key start
LH: loop header
LB: loop body
LE: loop exit
PB: predicated region body
PF: predicated region fallthrough
CT: control target
= control target key end

     0   :  { %v3416_v1 = vmov 0.0   ;;  %vm3417_vm0 = vmmov 0   ;;  %vm84_vm1 = vcmask 261120   ;;  %s4102_s0 = inlined_call_operand.vmem [shape: f32[2,8,32], index: 0, kind: input, shape index: {}]   ;;  %s4103_s1 = inlined_call_operand.vmem [shape: f32[8,32], index: 1, kind: input, shape index: {}]   ;;  %s4104_s2 = inlined_call_operand.vmem [shape: bf16[2,32,128], index: 2, kind: input, shape index: {}]   ;;  %s4105_s3 = inlined_call_operand.vmem [shape: bf16[2,160,32], index: 3, kind: input, shape index: {}]   ;;  %s4106_s4 = inlined_call_operand.vmem [shape: bf16[2,32,128], index: 4, kind: input, shape index: {}]   ;;  %s4107_s5 = inlined_call_operand.vmem [shape: f32[2,8,128], index: 5, kind: input, shape index: {}]   ;;  %s4108_s6 = inlined_call_operand.vmem [shape: bf16[32,128], index: 6, kind: input, shape index: {}]   ;;  %s4109_s7 = inlined_call_operand.vmem [shape: f32[1,128], index: 7, kind: input, shape index: {}]   ;;  %s4110_s8 = inlined_call_operand.hbm [shape: f32[2,128], index: 8, kind: output, shape index: {}]  }
   0x1   :  { %v3282_v0 = vld [vmem:[%s4104_s2] sm:$0xff]   ;;  %2946 = vmatprep.subr.bf16.mxu1 %v3416_v1  ;;  %v3283_v2 = vld [vmem:[%s4104_s2 + $0x8] sm:$0xff]   ;;  %2960 = vmatprep.subr.bf16.mxu0 %v3416_v1 }
   0x2   :  { %2947 = vmatpush3.bf16.msra.mxu1 %v3282_v0  ;;  %2950 = vmatprep.mubr.msk.bf16.mxu1 %vm3417_vm0, %v3416_v1  ;;  %v31_v3 = vld [vmem:[%s4102_s0] sm:$0xff]  ;;  %v32_v4 = vld [vmem:[%s4102_s0 + $0x8] sm:$0xff] }
   0x3   :  { %v33_v5 = vld [vmem:[%s4103_s1] sm:$0xff]  ;;  %2948 = vmatprep.subr.bf16.mxu1 %v3416_v1  ;;  %2962 = vmatprep.mubr.msk.bf16.mxu0 %vm3417_vm0, %v3416_v1 }
   0x4   :  { %v3499_v6 = vadd.f32 %v33_v5, %v31_v3  ;;  %v3501_v7 = vadd.f32 %v33_v5, %v32_v4 }
   0x6   :  { %v71_v8 = vpack.c.bf16 %v3501_v7, %v3499_v6  ;;  %2949 = vmatpush3.bf16.msra.mxu1 %v3283_v2 }
   0x7   :  { %2954 = vmatprep.subr.bf16.mxu1 %v3416_v1 }
   0x9   :  { %2951 = vmatmul.mubr.msk.bf16.vlgmr.msra.gmra.mrb[0].mxu1 %vm84_vm1, %v71_v8 }
   0xa   :  { %2956 = vmatprep.mubr.msk.bf16.mxu1 %vm3417_vm0, %v3416_v1 }
   0xb   :  { %13 = vsyncpa [#allocation3], 0  ;;  %s3418_s0 = smov 96   ;;  %vm134_vm2 = vcmask 64512   ;;  %v36_v19 = vlaneseq  ;;  %v3419_v22 = vmov -1e+30  }
   0xc   :  { %s3420_s1 = smov 64   ;;  %s3421_s15 = smov 88   ;;  %vm259_vm4 = vcmask 1043456   ;;  %vm1037_vm5 = vcmask 130048   ;;  %vm1040_vm6 = vcmask 195584   ;;  %vm2671_vm7 = vcmask 1041409  }
   0xd   :  { %v3531_v20 = vshrl.u32 %v36_v19, 7  ;;  %v39_v21 = vand.u32 127, %v36_v19  ;;  %s3422_s16 = smov 120   ;;  %s3423_s17 = smov 56  }
   0xe   :  { %s3424_s18 = smov 80   ;;  %s3425_s19 = smov 112  }
   0xf   :  { %vm40_vm3 = vcmp.le.s32.totalorder %v39_v21, %v3531_v20  ;;  %s3426_s20 = smov 48   ;;  %s3427_s21 = smov 72  }
  0x10   :  { %v3534_v23 = vsel %vm40_vm3, 0.0, %v3419_v22  ;;  %s3428_s22 = smov 104   ;;  %s3429_s23 = smov 40  }
  0x11   :  { %s3430_s24 = smov 8   ;;  %s3431_s25 = smov 16  }
  0x12   :  { %s3432_s30 = smov 24  }
  0xdc   :  { %v122_v9 = vpop.f32.mrb[0].mxu1 }
  0xdd   :  { %v3511_v10 = vpack.c.bf16 %v122_v9, %v122_v9  ;;  %v2952_v11 = vpop.f32.mrb[1].mxu1 }
  0xde   :  { %v125_v12 = vpop.f32.mrb[2].mxu1 }
  0xdf   :  { %132 = vrot.lane.b32.xlu0 %v3511_v10, %s3418_s0  ;;  %v2953_v13 = vpop.f32.mrb[3].mxu1  ;;  %v3515_v14 = vpack.c.bf16 %v125_v12, %v125_v12 }
  0xe3   :  { %182 = vrot.lane.b32.xlu0 %v3515_v14, %s3418_s0 }
 0x151   :  { %v133_v15 = vpop.permute.xlu0 %132 }
 0x152   :  { %v139_v16 = vsel %vm134_vm2, %v133_v15, 0 }
 0x153   :  { %2955 = vmatpush3.bf16.xpose.msra.mxu1 %v139_v16 }
 0x154   :  { %2966 = vmatprep.subr.bf16.mxu1 %v3416_v1 }
 0x155   :  { %v183_v17 = vpop.permute.xlu0 %182 }
 0x156   :  { %v188_v18 = vsel %vm134_vm2, %v183_v17, 0 }
 0x157   :  { %2961 = vmatpush3.bf16.xpose.msra.mxu0 %v188_v18 }
 0x158   :  { %2972 = vmatprep.subr.bf16.mxu0 %v3416_v1 }
 0x15a   :  { %2957 = vmatmul.mubr.msk.bf16.vlgmr.msra.gmra.mrb[4].mxu1 %vm134_vm2, %v3511_v10 }
 0x15b   :  { %2968 = vmatprep.mubr.msk.bf16.mxu1 %vm3417_vm0, %v3416_v1 }
 0x15e   :  { %2963 = vmatmul.mubr.msk.bf16.vlgmr.msra.gmra.mrb[0].mxu0 %vm134_vm2, %v3515_v14 }
 0x15f   :  { %2974 = vmatprep.mubr.msk.bf16.mxu0 %vm3417_vm0, %v3416_v1 }
 0x22d   :  { %v175_v24 = vpop.f32.mrb[4].mxu1 }
 0x22e   :  { %v176_v25 = vadd.f32 %v175_v24, %v3534_v23  ;;  %v2958_v26 = vpop.f32.mrb[5].mxu1 }
 0x22f   :  { %v178_v27 = vpop.f32.mrb[6].mxu1 }
 0x230   :  { %v2959_v28 = vpop.f32.mrb[7].mxu1  ;;  %v230_v29 = vsel %vm134_vm2, %v176_v25, -inf }
 0x231   :  { %v224_v30 = vpop.f32.mrb[0].mxu0  ;;  %231 = vmax.xlane.f32.xlu1 %v230_v29 }
 0x232   :  { %v225_v31 = vadd.f32 %v224_v30, %v3534_v23  ;;  %v2964_v32 = vpop.f32.mrb[1].mxu0 }
 0x233   :  { %v227_v33 = vpop.f32.mrb[2].mxu0 }
 0x234   :  { %v2965_v34 = vpop.f32.mrb[3].mxu0  ;;  %v233_v35 = vsel %vm134_vm2, %v225_v31, -inf }
 0x235   :  { %234 = vmax.xlane.f32.xlu1 %v233_v35 }
 0x246   :  { %254 = vrot.lane.b32.xlu1 %v3511_v10, %s3420_s1 }
 0x24a   :  { %303 = vrot.lane.b32.xlu1 %v3515_v14, %s3420_s1 }
 0x24e   :  { %353 = vrot.lane.b32.xlu1 %v3511_v10, %s3421_s15 }
 0x2be   :  { %v232_v36 = vpop.xlane.xlu1 %231 }
 0x2bf   :  { %v236_v37 = vsub.f32 %v176_v25, %v232_v36 }
 0x2c1   :  { %v238_v38 = vmul.f32 1.442695, %v236_v37 }
 0x2c2   :  { %v235_v39 = vpop.xlane.xlu1 %234 }
 0x2c3   :  { %3312 = vpow2.f32 %v238_v38  ;;  %v237_v40 = vsub.f32 %v225_v31, %v235_v39 }
 0x2c5   :  { %v240_v41 = vmul.f32 1.442695, %v237_v40 }
 0x2c6   :  { %v255_v42 = vpop.permute.xlu1 %254 }
 0x2c7   :  { %3314 = vpow2.f32 %v240_v41  ;;  %v261_v43 = vsel %vm259_vm4, %v255_v42, 0 }
 0x2c8   :  { %2967 = vmatpush3.bf16.msra.mxu1 %v261_v43 }
 0x2c9   :  { %2978 = vmatprep.subr.bf16.mxu1 %v3416_v1 }
 0x2ca   :  { %v304_v44 = vpop.permute.xlu1 %303 }
 0x2cb   :  { %v309_v45 = vsel %vm259_vm4, %v304_v44, 0 }
 0x2cc   :  { %2973 = vmatpush3.bf16.msra.mxu0 %v309_v45 }
 0x2cd   :  { %v3313_v46 = vpop.eup %3312  ;;  %2984 = vmatprep.subr.bf16.mxu0 %v3416_v1 }
 0x2ce   :  { %v242_v47 = vsel %vm134_vm2, %v3313_v46, 0.0  ;;  %v354_v50 = vpop.permute.xlu1 %353 }
 0x2cf   :  { %243 = vadd.xlane.f32.xlu0 %v242_v47  ;;  %v359_v57 = vsel %vm134_vm2, %v354_v50, 0 }
 0x2d1   :  { %v3315_v48 = vpop.eup %3314 }
 0x2d2   :  { %v245_v49 = vsel %vm134_vm2, %v3315_v48, 0.0 }
 0x2d3   :  { %246 = vadd.xlane.f32.xlu1 %v245_v49 }
 0x2e4   :  { %403 = vrot.lane.b32.xlu1 %v3515_v14, %s3421_s15 }
 0x2e5   :  { %351 = vrot.lane.b32.xlu0 %v3511_v10, %s3422_s16 }
 0x2e8   :  { %401 = vrot.lane.b32.xlu1 %v3515_v14, %s3422_s16 }
 0x35c   :  { %v244_v51 = vpop.xlane.xlu0 %243 }
 0x35d   :  { %3316 = vrcp.f32 %v244_v51 }
 0x360   :  { %v247_v52 = vpop.xlane.xlu1 %246  ;;  %v352_v62 = vpop.permute.xlu0 %351 }
 0x361   :  { %3318 = vrcp.f32 %v247_v52 }
 0x364   :  { %v404_v59 = vpop.permute.xlu1 %403 }
 0x365   :  { %v409_v61 = vsel %vm134_vm2, %v404_v59, 0 }
 0x367   :  { %v3317_v53 = vpop.eup %3316 }
 0x368   :  { %v250_v54 = vmul.f32 %v3317_v53, %v3313_v46  ;;  %v402_v63 = vpop.permute.xlu1 %401 }
 0x36a   :  { %v252_v55 = vpack.c.bf16 %v250_v54, %v250_v54 }
 0x36b   :  { %v3319_v56 = vpop.eup %3318 }
 0x36c   :  { %v251_v58 = vmul.f32 %v3319_v56, %v3315_v48  ;;  %2969 = vmatmul.mubr.msk.bf16.vlgmr.msra.gmra.mrb[8].mxu1 %vm134_vm2, %v252_v55 }
 0x36d   :  { %2979 = vmatpush3.bf16.xpose.msra.mxu1 %v359_v57  ;;  %2980 = vmatprep.mubr.msk.bf16.mxu1 %vm3417_vm0, %v3416_v1 }
 0x36e   :  { %v253_v60 = vpack.c.bf16 %v251_v58, %v251_v58  ;;  %2990 = vmatprep.subr.bf16.mxu1 %v3416_v1 }
 0x370   :  { %2975 = vmatmul.mubr.msk.bf16.vlgmr.msra.gmra.mrb[4].mxu0 %vm134_vm2, %v253_v60 }
 0x371   :  { %2985 = vmatpush3.bf16.xpose.msra.mxu0 %v409_v61  ;;  %2986 = vmatprep.mubr.msk.bf16.mxu0 %vm3417_vm0, %v3416_v1 }
 0x372   :  { %2996 = vmatprep.subr.bf16.mxu0 %v3416_v1 }
 0x374   :  { %2981 = vmatmul.mubr.msk.bf16.vlgmr.msra.gmra.mrb[12].mxu1 %vm134_vm2, %v352_v62 }
 0x375   :  { %2992 = vmatprep.mubr.msk.bf16.mxu1 %vm3417_vm0, %v3416_v1 }
 0x378   :  { %2987 = vmatmul.mubr.msk.bf16.vlgmr.msra.gmra.mrb[8].mxu0 %vm134_vm2, %v402_v63 }
 0x379   :  { %2998 = vmatprep.mubr.msk.bf16.mxu0 %vm3417_vm0, %v3416_v1 }
 0x43f   :  { %v3574_v0 = vpop.f32.mrb[8].mxu1 }
 0x440   :  { %v2970_v2 = vpop.f32.mrb[9].mxu1 }
 0x441   :  { %v300_v3 = vpop.f32.mrb[10].mxu1 }
 0x442   :  { %v2971_v4 = vpop.f32.mrb[11].mxu1 }
 0x443   :  { %v3576_v5 = vpop.f32.mrb[4].mxu0 }
 0x444   :  { %v2976_v8 = vpop.f32.mrb[5].mxu0 }
 0x445   :  { %v348_v9 = vpop.f32.mrb[6].mxu0 }
 0x446   :  { %v2977_v11 = vpop.f32.mrb[7].mxu0 }
 0x447   :  { %v395_v12 = vpop.f32.mrb[12].mxu1 }
 0x448   :  { %v396_v13 = vadd.f32 %v395_v12, %v3534_v23  ;;  %v2982_v15 = vpop.f32.mrb[13].mxu1 }
 0x449   :  { %v398_v16 = vpop.f32.mrb[14].mxu1 }
 0x44a   :  { %v2983_v17 = vpop.f32.mrb[15].mxu1  ;;  %v451_v18 = vsel %vm134_vm2, %v396_v13, -inf }
 0x44b   :  { %v445_v19 = vpop.f32.mrb[8].mxu0  ;;  %452 = vmax.xlane.f32.xlu1 %v451_v18 }
 0x44c   :  { %v446_v21 = vadd.f32 %v445_v19, %v3534_v23  ;;  %v2988_v22 = vpop.f32.mrb[9].mxu0 }
 0x44d   :  { %v448_v24 = vpop.f32.mrb[10].mxu0 }
 0x44e   :  { %v2989_v25 = vpop.f32.mrb[11].mxu0  ;;  %v454_v26 = vsel %vm134_vm2, %v446_v21, -inf }
 0x44f   :  { %455 = vmax.xlane.f32.xlu0 %v454_v26 }
 0x45c   :  { %475 = vrot.lane.b32.xlu1 %v3511_v10, %s3423_s17 }
 0x460   :  { %573 = vrot.lane.b32.xlu1 %v3511_v10, %s3424_s18 }
 0x465   :  { %523 = vrot.lane.b32.xlu0 %v3515_v14, %s3423_s17 }
 0x469   :  { %571 = vrot.lane.b32.xlu0 %v3511_v10, %s3425_s19 }
 0x4d8   :  { %v453_v27 = vpop.xlane.xlu1 %452 }
 0x4d9   :  { %v457_v28 = vsub.f32 %v396_v13, %v453_v27 }
 0x4db   :  { %v459_v29 = vmul.f32 1.442695, %v457_v28 }
 0x4dc   :  { %v456_v30 = vpop.xlane.xlu0 %455  ;;  %v476_v31 = vpop.permute.xlu1 %475 }
 0x4dd   :  { %3320 = vpow2.f32 %v459_v29  ;;  %v458_v32 = vsub.f32 %v446_v21, %v456_v30  ;;  %v481_v33 = vsel %vm259_vm4, %v476_v31, 0 }
 0x4de   :  { %2991 = vmatpush3.bf16.msra.mxu1 %v481_v33 }
 0x4df   :  { %v461_v34 = vmul.f32 1.442695, %v458_v32  ;;  %3002 = vmatprep.subr.bf16.mxu1 %v3416_v1 }
 0x4e0   :  { %v524_v35 = vpop.permute.xlu0 %523  ;;  %v574_v41 = vpop.permute.xlu1 %573 }
 0x4e1   :  { %3322 = vpow2.f32 %v461_v34  ;;  %v529_v36 = vsel %vm259_vm4, %v524_v35, 0  ;;  %v579_v48 = vsel %vm134_vm2, %v574_v41, 0 }
 0x4e2   :  { %2997 = vmatpush3.bf16.msra.mxu0 %v529_v36 }
 0x4e3   :  { %3008 = vmatprep.subr.bf16.mxu0 %v3416_v1 }
 0x4e4   :  { %v572_v53 = vpop.permute.xlu0 %571 }
 0x4e7   :  { %v3321_v37 = vpop.eup %3320 }
 0x4e8   :  { %v463_v38 = vsel %vm134_vm2, %v3321_v37, 0.0 }
 0x4e9   :  { %464 = vadd.xlane.f32.xlu1 %v463_v38 }
 0x4eb   :  { %v3323_v39 = vpop.eup %3322 }
 0x4ec   :  { %v466_v40 = vsel %vm134_vm2, %v3323_v39, 0.0 }
 0x4ed   :  { %467 = vadd.xlane.f32.xlu1 %v466_v40 }
 0x4fe   :  { %623 = vrot.lane.b32.xlu1 %v3515_v14, %s3424_s18 }
 0x502   :  { %621 = vrot.lane.b32.xlu1 %v3515_v14, %s3425_s19 }
 0x576   :  { %v465_v42 = vpop.xlane.xlu1 %464 }
 0x577   :  { %3324 = vrcp.f32 %v465_v42 }
 0x57a   :  { %v468_v43 = vpop.xlane.xlu1 %467 }
 0x57b   :  { %3326 = vrcp.f32 %v468_v43 }
 0x57e   :  { %v624_v50 = vpop.permute.xlu1 %623 }
 0x57f   :  { %v629_v52 = vsel %vm134_vm2, %v624_v50, 0 }
 0x581   :  { %v3325_v44 = vpop.eup %3324 }
 0x582   :  { %v471_v45 = vmul.f32 %v3325_v44, %v3321_v37  ;;  %v622_v54 = vpop.permute.xlu1 %621 }
 0x584   :  { %v473_v46 = vpack.c.bf16 %v471_v45, %v471_v45 }
 0x585   :  { %v3327_v47 = vpop.eup %3326 }
 0x586   :  { %v472_v49 = vmul.f32 %v3327_v47, %v3323_v39  ;;  %2993 = vmatmul.mubr.msk.bf16.vlgmr.msra.gmra.mrb[16].mxu1 %vm134_vm2, %v473_v46 }
 0x587   :  { %3003 = vmatpush3.bf16.xpose.msra.mxu1 %v579_v48  ;;  %3004 = vmatprep.mubr.msk.bf16.mxu1 %vm3417_vm0, %v3416_v1 }
 0x588   :  { %v474_v51 = vpack.c.bf16 %v472_v49, %v472_v49  ;;  %3014 = vmatprep.subr.bf16.mxu1 %v3416_v1 }
 0x58a   :  { %2999 = vmatmul.mubr.msk.bf16.vlgmr.msra.gmra.mrb[12].mxu0 %vm134_vm2, %v474_v51 }
 0x58b   :  { %3009 = vmatpush3.bf16.xpose.msra.mxu0 %v629_v52  ;;  %3010 = vmatprep.mubr.msk.bf16.mxu0 %vm3417_vm0, %v3416_v1 }
 0x58c   :  { %3020 = vmatprep.subr.bf16.mxu0 %v3416_v1 }
 0x58e   :  { %3005 = vmatmul.mubr.msk.bf16.vlgmr.msra.gmra.mrb[20].mxu1 %vm134_vm2, %v572_v53 }
 0x58f   :  { %3016 = vmatprep.mubr.msk.bf16.mxu1 %vm3417_vm0, %v3416_v1 }
 0x592   :  { %3011 = vmatmul.mubr.msk.bf16.vlgmr.msra.gmra.mrb[16].mxu0 %vm134_vm2, %v622_v54 }
 0x593   :  { %3022 = vmatprep.mubr.msk.bf16.mxu0 %vm3417_vm0, %v3416_v1 }
 0x659   :  { %v3616_v55 = vpop.f32.mrb[16].mxu1 }
 0x65a   :  { %v2994_v56 = vpop.f32.mrb[17].mxu1 }
 0x65b   :  { %v520_v57 = vpop.f32.mrb[18].mxu1 }
 0x65c   :  { %v2995_v58 = vpop.f32.mrb[19].mxu1 }
 0x65d   :  { %v3618_v59 = vpop.f32.mrb[12].mxu0 }
 0x65e   :  { %v3252_v60 = vpack.i.bf16 %v3618_v59, %v3616_v55  ;;  %v3000_v61 = vpop.f32.mrb[13].mxu0 }
 0x65f   :  { %v568_v62 = vpop.f32.mrb[14].mxu0 }
 0x660   :  { %v3001_v63 = vpop.f32.mrb[15].mxu0 }
 0x661   :  { %v615_v2 = vpop.f32.mrb[20].mxu1 }
 0x662   :  { %v616_v3 = vadd.f32 %v615_v2, %v3534_v23  ;;  %v3006_v4 = vpop.f32.mrb[21].mxu1 }
 0x663   :  { %v618_v8 = vpop.f32.mrb[22].mxu1 }
 0x664   :  { %v3007_v9 = vpop.f32.mrb[23].mxu1  ;;  %v671_v11 = vsel %vm134_vm2, %v616_v3, -inf }
 0x665   :  { %v665_v12 = vpop.f32.mrb[16].mxu0  ;;  %672 = vmax.xlane.f32.xlu0 %v671_v11 }
 0x666   :  { %v666_v13 = vadd.f32 %v665_v12, %v3534_v23  ;;  %v3012_v15 = vpop.f32.mrb[17].mxu0 }
 0x667   :  { %v668_v16 = vpop.f32.mrb[18].mxu0 }
 0x668   :  { %v3013_v17 = vpop.f32.mrb[19].mxu0  ;;  %v674_v18 = vsel %vm134_vm2, %v666_v13, -inf }
 0x669   :  { %675 = vmax.xlane.f32.xlu1 %v674_v18 }
 0x67a   :  { %695 = vrot.lane.b32.xlu1 %v3511_v10, %s3426_s20 }
 0x67e   :  { %793 = vrot.lane.b32.xlu1 %v3511_v10, %s3427_s21 }
 0x682   :  { %843 = vrot.lane.b32.xlu1 %v3515_v14, %s3427_s21 }
 0x686   :  { %841 = vrot.lane.b32.xlu1 %v3515_v14, %s3428_s22 }
 0x6f2   :  { %v673_v19 = vpop.xlane.xlu0 %672 }
 0x6f3   :  { %v677_v21 = vsub.f32 %v616_v3, %v673_v19 }
 0x6f5   :  { %v679_v22 = vmul.f32 1.442695, %v677_v21 }
 0x6f6   :  { %v676_v24 = vpop.xlane.xlu1 %675 }
 0x6f7   :  { %3328 = vpow2.f32 %v679_v22  ;;  %v678_v25 = vsub.f32 %v666_v13, %v676_v24 }
 0x6f9   :  { %v681_v26 = vmul.f32 1.442695, %v678_v25 }
 0x6fa   :  { %v696_v27 = vpop.permute.xlu1 %695 }
 0x6fb   :  { %3330 = vpow2.f32 %v681_v26  ;;  %v701_v28 = vsel %vm259_vm4, %v696_v27, 0 }
 0x6fc   :  { %3015 = vmatpush3.bf16.msra.mxu1 %v701_v28 }
 0x6fd   :  { %3026 = vmatprep.subr.bf16.mxu1 %v3416_v1 }
 0x6fe   :  { %v794_v38 = vpop.permute.xlu1 %793 }
 0x6ff   :  { %v799_v42 = vsel %vm134_vm2, %v794_v38, 0 }
 0x701   :  { %v3329_v29 = vpop.eup %3328 }
 0x702   :  { %v683_v30 = vsel %vm134_vm2, %v3329_v29, 0.0  ;;  %v844_v44 = vpop.permute.xlu1 %843 }
 0x703   :  { %684 = vadd.xlane.f32.xlu0 %v683_v30  ;;  %v849_v46 = vsel %vm134_vm2, %v844_v44, 0 }
 0x705   :  { %v3331_v31 = vpop.eup %3330 }
 0x706   :  { %v686_v32 = vsel %vm134_vm2, %v3331_v31, 0.0  ;;  %v842_v48 = vpop.permute.xlu1 %841 }
 0x707   :  { %687 = vadd.xlane.f32.xlu0 %v686_v32 }
 0x71d   :  { %743 = vrot.lane.b32.xlu0 %v3515_v14, %s3426_s20 }
 0x721   :  { %791 = vrot.lane.b32.xlu0 %v3511_v10, %s3428_s22 }
 0x790   :  { %v685_v33 = vpop.xlane.xlu0 %684 }
 0x791   :  { %3332 = vrcp.f32 %v685_v33 }
 0x794   :  { %v688_v34 = vpop.xlane.xlu0 %687 }
 0x795   :  { %3334 = vrcp.f32 %v688_v34 }
 0x798   :  { %v744_v35 = vpop.permute.xlu0 %743 }
 0x799   :  { %v749_v36 = vsel %vm259_vm4, %v744_v35, 0  ;;  %v3284_v35 = vld [vmem:[%s4105_s3] sm:$0xff]  }
 0x79a   :  { %3021 = vmatpush3.bf16.msra.mxu0 %v749_v36  ;;  %v3285_v36 = vld [vmem:[%s4105_s3 + $0x8] sm:$0xff]  }
 0x79b   :  { %v3333_v37 = vpop.eup %3332  ;;  %3032 = vmatprep.subr.bf16.mxu0 %v3416_v1 }
 0x79c   :  { %v691_v39 = vmul.f32 %v3333_v37, %v3329_v29  ;;  %v792_v47 = vpop.permute.xlu0 %791 }
 0x79e   :  { %v693_v40 = vpack.c.bf16 %v691_v39, %v691_v39 }
 0x79f   :  { %v3335_v41 = vpop.eup %3334 }
 0x7a0   :  { %v692_v43 = vmul.f32 %v3335_v41, %v3331_v31  ;;  %3017 = vmatmul.mubr.msk.bf16.vlgmr.msra.gmra.mrb[24].mxu1 %vm134_vm2, %v693_v40 }
 0x7a1   :  { %3027 = vmatpush3.bf16.xpose.msra.mxu1 %v799_v42  ;;  %3028 = vmatprep.mubr.msk.bf16.mxu1 %vm3417_vm0, %v3416_v1 }
 0x7a2   :  { %v694_v45 = vpack.c.bf16 %v692_v43, %v692_v43  ;;  %3038 = vmatprep.subr.bf16.mxu1 %v3416_v1 }
 0x7a4   :  { %3023 = vmatmul.mubr.msk.bf16.vlgmr.msra.gmra.mrb[20].mxu0 %vm134_vm2, %v694_v45 }
 0x7a5   :  { %3033 = vmatpush3.bf16.xpose.msra.mxu0 %v849_v46  ;;  %3034 = vmatprep.mubr.msk.bf16.mxu0 %vm3417_vm0, %v3416_v1 }
 0x7a6   :  { %3044 = vmatprep.subr.bf16.mxu0 %v3416_v1 }
 0x7a8   :  { %3029 = vmatmul.mubr.msk.bf16.vlgmr.msra.gmra.mrb[28].mxu1 %vm134_vm2, %v792_v47 }
 0x7a9   :  { %3040 = vmatprep.mubr.msk.bf16.mxu1 %vm3417_vm0, %v3416_v1 }
 0x7ac   :  { %3035 = vmatmul.mubr.msk.bf16.vlgmr.msra.gmra.mrb[24].mxu0 %vm134_vm2, %v842_v48 }
 0x7ad   :  { %3046 = vmatprep.mubr.msk.bf16.mxu0 %vm3417_vm0, %v3416_v1 }
 0x873   :  { %v737_v49 = vpop.f32.mrb[24].mxu1 }
 0x874   :  { %v3018_v50 = vpop.f32.mrb[25].mxu1 }
 0x875   :  { %v740_v51 = vpop.f32.mrb[26].mxu1 }
 0x876   :  { %v3019_v52 = vpop.f32.mrb[27].mxu1 }
 0x877   :  { %v785_v53 = vpop.f32.mrb[20].mxu0 }
 0x878   :  { %v3257_v54 = vpack.i.bf16 %v785_v53, %v737_v49  ;;  %v3024_v56 = vpop.f32.mrb[21].mxu0 }
 0x879   :  { %v788_v57 = vpop.f32.mrb[22].mxu0 }
 0x87a   :  { %v3025_v58 = vpop.f32.mrb[23].mxu0 }
 0x87b   :  { %v835_v61 = vpop.f32.mrb[28].mxu1 }
 0x87c   :  { %v836_v62 = vadd.f32 %v835_v61, %v3534_v23  ;;  %v3030_v63 = vpop.f32.mrb[29].mxu1 }
 0x87d   :  { %v838_v2 = vpop.f32.mrb[30].mxu1 }
 0x87e   :  { %v3031_v3 = vpop.f32.mrb[31].mxu1  ;;  %v891_v4 = vsel %vm134_vm2, %v836_v62, -inf }
 0x87f   :  { %v885_v8 = vpop.f32.mrb[24].mxu0  ;;  %892 = vmax.xlane.f32.xlu0 %v891_v4 }
 0x880   :  { %v886_v9 = vadd.f32 %v885_v8, %v3534_v23  ;;  %v3036_v11 = vpop.f32.mrb[25].mxu0 }
 0x881   :  { %v888_v12 = vpop.f32.mrb[26].mxu0 }
 0x882   :  { %v3037_v13 = vpop.f32.mrb[27].mxu0  ;;  %v894_v15 = vsel %vm134_vm2, %v886_v9, -inf }
 0x883   :  { %895 = vmax.xlane.f32.xlu1 %v894_v15 }
 0x894   :  { %915 = vrot.lane.b32.xlu1 %v3511_v10, %s3429_s23 }
 0x898   :  { %3253 = vrot.lane.b32.xlu1 %v3252_v60, %s3430_s24 }
 0x89c   :  { %3258 = vrot.lane.b32.xlu1 %v3257_v54, %s3431_s25 }
 0x90c   :  { %v893_v16 = vpop.xlane.xlu0 %892 }
 0x90d   :  { %v897_v17 = vsub.f32 %v836_v62, %v893_v16 }
 0x90f   :  { %v899_v18 = vmul.f32 1.442695, %v897_v17 }
 0x910   :  { %v896_v19 = vpop.xlane.xlu1 %895 }
 0x911   :  { %3336 = vpow2.f32 %v899_v18  ;;  %v898_v21 = vsub.f32 %v886_v9, %v896_v19 }
 0x913   :  { %v901_v22 = vmul.f32 1.442695, %v898_v21 }
 0x914   :  { %v916_v24 = vpop.permute.xlu1 %915 }
 0x915   :  { %3338 = vpow2.f32 %v901_v22  ;;  %v921_v10 = vsel %vm259_vm4, %v916_v24, 0 }
 0x916   :  { %3039 = vmatpush3.bf16.msra.mxu1 %v921_v10 }
 0x917   :  { %3050 = vmatprep.subr.bf16.mxu1 %v3416_v1 }
 0x918   :  { %v3254_v46 = vpop.permute.xlu1 %3253 }
 0x919   :  { %v3256_v48 = vunpack.i.h.bf16 %v3254_v46  ;;  %v3255_v49 = vunpack.i.l.bf16 %v3254_v46 }
 0x91b   :  { %v3337_v25 = vpop.eup %3336  ;;  %v1036_v53 = vsel %vm134_vm2, %v3576_v5, %v3256_v48  ;;  %v1035_v54 = vsel %vm134_vm2, %v3574_v0, %v3255_v49  ;;  %v1046_v5 = vsub.s32 0, %v3531_v20  ;;  %v3709_v0 = vld [vmem:[%s4107_s5] sm:$0xff] }
 0x91c   :  { %v903_v55 = vsel %vm134_vm2, %v3337_v25, 0.0  ;;  %v3259_v47 = vpop.permute.xlu1 %3258 }
 0x91d   :  { %904 = vadd.xlane.f32.xlu0 %v903_v55  ;;  %v3261_v50 = vunpack.i.h.bf16 %v3259_v47  ;;  %v3260_v51 = vunpack.i.l.bf16 %v3259_v47  ;;  %v1047_v3 = vrot.slane %v3709_v0, %v1046_v5 }
 0x91f   :  { %v3339_v59 = vpop.eup %3338  ;;  %v1039_v58 = vsel %vm1037_vm5, %v1036_v53, %v3261_v50  ;;  %v1038_v61 = vsel %vm1037_vm5, %v1035_v54, %v3260_v51  ;;  %v3294_v51 = vld [vmem:[%s4105_s3 + $0x40] sm:$0xff]   ;;  %v1148_v53 = vsub.s32 3, %v3531_v20 }
 0x920   :  { %v906_v60 = vsel %vm134_vm2, %v3339_v59, 0.0 }
 0x921   :  { %907 = vadd.xlane.f32.xlu0 %v906_v60  ;;  %v1149_v54 = vrot.slane %v3709_v0, %v1148_v53 }
 0x937   :  { %963 = vrot.lane.b32.xlu0 %v3515_v14, %s3429_s23 }
 0x9aa   :  { %v905_v26 = vpop.xlane.xlu0 %904 }
 0x9ab   :  { %3340 = vrcp.f32 %v905_v26  ;;  %v3287_v26 = vld [vmem:[%s4106_s4 + $0x8] sm:$0xff]  }
 0x9ae   :  { %v908_v27 = vpop.xlane.xlu0 %907 }
 0x9af   :  { %3342 = vrcp.f32 %v908_v27  ;;  %v3288_v27 = vld [vmem:[%s4105_s3 + $0x10] sm:$0xff]  }
 0x9b2   :  { %v964_v28 = vpop.permute.xlu0 %963 }
 0x9b3   :  { %v969_v29 = vsel %vm259_vm4, %v964_v28, 0  ;;  %v3289_v28 = vld [vmem:[%s4105_s3 + $0x18] sm:$0xff]  }
 0x9b4   :  { %3045 = vmatpush3.bf16.msra.mxu0 %v969_v29  ;;  %v3290_v29 = vld [vmem:[%s4105_s3 + $0x20] sm:$0xff]  }
 0x9b5   :  { %v3341_v30 = vpop.eup %3340  ;;  %3058 = vmatprep.subr.bf16.mxu0 %v3416_v1 }
 0x9b6   :  { %v911_v31 = vmul.f32 %v3341_v30, %v3337_v25  ;;  %v3291_v30 = vld [vmem:[%s4105_s3 + $0x28] sm:$0xff]  }
 0x9b8   :  { %v913_v32 = vpack.c.bf16 %v911_v31, %v911_v31  ;;  %v3292_v31 = vld [vmem:[%s4105_s3 + $0x30] sm:$0xff]  }
 0x9b9   :  { %v3343_v33 = vpop.eup %3342 }
 0x9ba   :  { %v912_v34 = vmul.f32 %v3343_v33, %v3339_v59  ;;  %3041 = vmatmul.mubr.msk.bf16.vlgmr.msra.gmra.mrb[32].mxu1 %vm134_vm2, %v913_v32  ;;  %v3293_v32 = vld [vmem:[%s4105_s3 + $0x38] sm:$0xff]  }
 0x9bb   :  { %3054 = vmatprep.mubr.msk.bf16.mxu1 %vm3417_vm0, %v3416_v1  ;;  %3051 = vmatpush3.bf16.msra.mxu1 %v3284_v35 }
 0x9bc   :  { %v914_v14 = vpack.c.bf16 %v912_v34, %v912_v34  ;;  %3052 = vmatprep.subr.bf16.mxu1 %v3416_v1 }
 0x9be   :  { %3047 = vmatmul.mubr.msk.bf16.vlgmr.msra.gmra.mrb[28].mxu0 %vm134_vm2, %v914_v14 }
 0x9bf   :  { %3062 = vmatprep.mubr.msk.bf16.mxu0 %vm3417_vm0, %v3416_v1  ;;  %3053 = vmatpush3.bf16.msra.mxu1 %v3285_v36 }
 0x9c0   :  { %3066 = vmatprep.subr.bf16.mxu1 %v3416_v1 }
 0xa8d   :  { %v957_v37 = vpop.f32.mrb[32].mxu1 }
 0xa8e   :  { %v3042_v38 = vpop.f32.mrb[33].mxu1 }
 0xa8f   :  { %v960_v39 = vpop.f32.mrb[34].mxu1  ;;  %v1135_v38 = vsub.s32 1, %v3531_v20 }
 0xa90   :  { %v3043_v40 = vpop.f32.mrb[35].mxu1 }
 0xa91   :  { %v1005_v41 = vpop.f32.mrb[28].mxu0  ;;  %v1136_v39 = vrot.slane %v3709_v0, %v1135_v38  ;;  %v1141_v40 = vsub.s32 2, %v3531_v20 }
 0xa92   :  { %v3262_v42 = vpack.i.bf16 %v1005_v41, %v957_v37  ;;  %v3048_v43 = vpop.f32.mrb[29].mxu0 }
 0xa93   :  { %v1008_v44 = vpop.f32.mrb[30].mxu0  ;;  %v1142_v46 = vrot.slane %v3709_v0, %v1141_v40 }
 0xa94   :  { %v3049_v45 = vpop.f32.mrb[31].mxu0  ;;  %3263 = vrot.lane.b32.xlu0 %v3262_v42, %s3432_s30 }
 0xb06   :  { %v3264_v52 = vpop.permute.xlu0 %3263 }
 0xb07   :  { %v3266_v56 = vunpack.i.h.bf16 %v3264_v52  ;;  %v3265_v57 = vunpack.i.l.bf16 %v3264_v52  ;;  %v3295_v52 = vld [vmem:[%s4105_s3 + $0x48] sm:$0xff]  }
 0xb09   :  { %v1042_v62 = vsel %vm1040_vm6, %v1039_v58, %v3266_v56  ;;  %v1041_v63 = vsel %vm1040_vm6, %v1038_v61, %v3265_v57 }
 0xb0a   :  { %v1043_v2 = vpack.c.bf16 %v1042_v62, %v1041_v63 }
 0xb0c   :  { %3055 = vmatmul.mubr.msk.bf16.vlgmr.msra.gmra.mrb[36].mxu1 %vm84_vm1, %v1043_v2 }
 0xb0d   :  { %3082 = vmatprep.mubr.msk.bf16.mxu1 %vm3417_vm0, %v3416_v1  ;;  %3067 = vmatpush3.bf16.msra.mxu1 %v3288_v27 }
 0xb0e   :  { %3068 = vmatprep.subr.bf16.mxu1 %v3416_v1 }
 0xb11   :  { %3069 = vmatpush3.bf16.msra.mxu1 %v3289_v28  ;;  %v3296_v28 = vld [vmem:[%s4104_s2 + $0x10] sm:$0xff]  }
 0xb12   :  { %3070 = vmatprep.subr.bf16.mxu1 %v3416_v1 }
 0xb15   :  { %3071 = vmatpush3.bf16.msra.mxu1 %v3290_v29  ;;  %v3297_v29 = vld [vmem:[%s4104_s2 + $0x18] sm:$0xff]  }
 0xb16   :  { %3072 = vmatprep.subr.bf16.mxu1 %v3416_v1 }
 0xb19   :  { %3073 = vmatpush3.bf16.msra.mxu1 %v3291_v30 }
 0xb1a   :  { %3074 = vmatprep.subr.bf16.mxu1 %v3416_v1 }
 0xb1d   :  { %3075 = vmatpush3.bf16.msra.mxu1 %v3292_v31 }
 0xb1e   :  { %3076 = vmatprep.subr.bf16.mxu1 %v3416_v1 }
 0xb21   :  { %3077 = vmatpush3.bf16.msra.mxu1 %v3293_v32 }
 0xb22   :  { %3078 = vmatprep.subr.bf16.mxu1 %v3416_v1 }
 0xb25   :  { %3079 = vmatpush3.bf16.msra.mxu1 %v3294_v51 }
 0xb26   :  { %3080 = vmatprep.subr.bf16.mxu1 %v3416_v1 }
 0xb29   :  { %3081 = vmatpush3.bf16.msra.mxu1 %v3295_v52 }
 0xb2a   :  { %3112 = vmatprep.subr.bf16.mxu1 %v3416_v1 }
 0xbdf   :  { %v1097_v4 = vpop.f32.mrb[36].mxu1 }
 0xbe0   :  { %v1098_v8 = vadd.f32 %v1097_v4, %v1047_v3  ;;  %v3056_v9 = vpop.f32.mrb[37].mxu1 }
 0xbe1   :  { %v1100_v11 = vpop.f32.mrb[38].mxu1 }
 0xbe2   :  { %v1101_v12 = vadd.f32 %v1100_v11, %v1047_v3  ;;  %v3057_v13 = vpop.f32.mrb[39].mxu1  ;;  %v1104_v15 = vadd.f32 %v1098_v8, %v3499_v6  ;;  %v1211_v8 = vsub.s32 4, %v3531_v20 }
 0xbe4   :  { %v1106_v16 = vsel %vm84_vm1, %v1104_v15, 0.0  ;;  %v1105_v17 = vadd.f32 %v1101_v12, %v3501_v7  ;;  %v3286_v7 = vld [vmem:[%s4106_s4] sm:$0xff]   ;;  %v1212_v9 = vrot.slane %v3709_v0, %v1211_v8 }
 0xbe5   :  { %1107 = vadd.xlane.f32.xlu1 %v1106_v16  ;;  %3059 = vmatpush3.bf16.msra.mxu0 %v3286_v7 }
 0xbe6   :  { %v1109_v18 = vsel %vm84_vm1, %v1105_v17, 0.0  ;;  %3060 = vmatprep.subr.bf16.mxu0 %v3416_v1 }
 0xbe7   :  { %1110 = vadd.xlane.f32.xlu0 %v1109_v18 }
 0xbe9   :  { %3061 = vmatpush3.bf16.msra.mxu0 %v3287_v26 }
 0xbea   :  { %3086 = vmatprep.subr.bf16.mxu0 %v3416_v1 }
 0xc72   :  { %v1108_v19 = vpop.xlane.xlu1 %1107 }
 0xc73   :  { %v1113_v21 = vmul.f32 0.03125, %v1108_v19 }
 0xc74   :  { %v1111_v22 = vpop.xlane.xlu0 %1110 }
 0xc75   :  { %v1115_v24 = vsub.f32 %v1104_v15, %v1113_v21  ;;  %v1114_v10 = vmul.f32 0.03125, %v1111_v22 }
 0xc77   :  { %v1116_v25 = vsub.f32 %v1105_v17, %v1114_v10  ;;  %v1117_v55 = vmul.f32 %v1115_v24, %v1115_v24 }
 0xc79   :  { %v1119_v59 = vsel %vm84_vm1, %v1117_v55, 0.0  ;;  %v1118_v60 = vmul.f32 %v1116_v25, %v1116_v25 }
 0xc7a   :  { %1120 = vadd.xlane.f32.xlu0 %v1119_v59 }
 0xc7b   :  { %v1122_v6 = vsel %vm84_vm1, %v1118_v60, 0.0 }
 0xc7c   :  { %1123 = vadd.xlane.f32.xlu1 %v1122_v6 }
 0xd07   :  { %v1121_v33 = vpop.xlane.xlu0 %1120 }
 0xd08   :  { %v1125_v34 = vmul.f32 0.03125, %v1121_v33 }
 0xd09   :  { %v1124_v14 = vpop.xlane.xlu1 %1123 }
 0xd0a   :  { %v1127_v35 = vadd.f32 1e-05, %v1125_v34  ;;  %v1126_v36 = vmul.f32 0.03125, %v1124_v14 }
 0xd0c   :  { %3344 = vrsqrt.f32 %v1127_v35  ;;  %v1128_v37 = vadd.f32 1e-05, %v1126_v36  ;;  %v1332_v35 = vsub.s32 5, %v3531_v20 }
 0xd0e   :  { %3346 = vrsqrt.f32 %v1128_v37  ;;  %v1333_v36 = vrot.slane %v3709_v0, %v1332_v35  ;;  %v1338_v37 = vsub.s32 6, %v3531_v20 }
 0xd16   :  { %v3345_v41 = vpop.eup %3344 }
 0xd17   :  { %v1131_v42 = vmul.f32 %v3345_v41, %v1115_v24 }
 0xd18   :  { %v3347_v43 = vpop.eup %3346 }
 0xd19   :  { %v1137_v44 = vmul.f32 %v1136_v39, %v1131_v42  ;;  %v1132_v45 = vmul.f32 %v3347_v43, %v1116_v25 }
 0xd1b   :  { %v1138_v47 = vmul.f32 %v1136_v39, %v1132_v45  ;;  %v1143_v48 = vadd.f32 %v1142_v46, %v1137_v44  ;;  %v1339_v45 = vrot.slane %v3709_v0, %v1338_v37 }
 0xd1d   :  { %v1144_v49 = vadd.f32 %v1142_v46, %v1138_v47 }
 0xd1f   :  { %v1145_v50 = vpack.c.bf16 %v1144_v49, %v1143_v48 }
 0xd21   :  { %3063 = vmatmul.mubr.msk.bf16.vlgmr.msra.gmra.mrb[32].mxu0 %vm84_vm1, %v1145_v50 }
 0xd22   :  { %3090 = vmatprep.mubr.msk.bf16.mxu0 %vm3417_vm0, %v3416_v1  ;;  %3087 = vmatpush3.bf16.msra.mxu0 %v3296_v28 }
 0xd23   :  { %3088 = vmatprep.subr.bf16.mxu0 %v3416_v1 }
 0xd26   :  { %3089 = vmatpush3.bf16.msra.mxu0 %v3297_v29 }
 0xd27   :  { %3094 = vmatprep.subr.bf16.mxu0 %v3416_v1 }
 0xdf4   :  { %v1199_v56 = vpop.f32.mrb[32].mxu0 }
 0xdf5   :  { %v1200_v57 = vadd.f32 %v1199_v56, %v1149_v54  ;;  %v3064_v58 = vpop.f32.mrb[33].mxu0 }
 0xdf6   :  { %v1202_v61 = vpop.f32.mrb[34].mxu0 }
 0xdf7   :  { %v1203_v62 = vadd.f32 %v1202_v61, %v1149_v54  ;;  %v3065_v63 = vpop.f32.mrb[35].mxu0  ;;  %v1206_v2 = vmax.f32 %v1200_v57, 0.0 }
 0xdf9   :  { %v1207_v3 = vmax.f32 %v1203_v62, 0.0 }
 0xdfb   :  { %v1208_v4 = vpack.c.bf16 %v1207_v3, %v1206_v2 }
 0xdfd   :  { %3083 = vmatmul.mubr.bf16.vlgmr.msra.gmra.mrb[40].mxu1 %v1208_v4 }
 0xdfe   :  { %3114 = vmatprep.mubr.msk.bf16.mxu1 %vm3417_vm0, %v3416_v1 }
 0xed0   :  { %v1295_v11 = vpop.f32.mrb[40].mxu1 }
 0xed1   :  { %v1296_v12 = vadd.f32 %v1295_v11, %v1212_v9  ;;  %v3084_v13 = vpop.f32.mrb[41].mxu1 }
 0xed2   :  { %v1298_v15 = vpop.f32.mrb[42].mxu1 }
 0xed3   :  { %v1299_v16 = vadd.f32 %v1298_v15, %v1212_v9  ;;  %v3085_v17 = vpop.f32.mrb[43].mxu1  ;;  %v1302_v18 = vadd.f32 %v1296_v12, %v1143_v48 }
 0xed5   :  { %v1304_v19 = vsel %vm84_vm1, %v1302_v18, 0.0  ;;  %v1303_v21 = vadd.f32 %v1299_v16, %v1144_v49 }
 0xed6   :  { %1305 = vadd.xlane.f32.xlu0 %v1304_v19 }
 0xed7   :  { %v1307_v22 = vsel %vm84_vm1, %v1303_v21, 0.0 }
 0xed8   :  { %1308 = vadd.xlane.f32.xlu1 %v1307_v22 }
 0xf63   :  { %v1306_v24 = vpop.xlane.xlu0 %1305 }
 0xf64   :  { %v1310_v10 = vmul.f32 0.03125, %v1306_v24 }
 0xf65   :  { %v1309_v25 = vpop.xlane.xlu1 %1308 }
 0xf66   :  { %v1312_v55 = vsub.f32 %v1302_v18, %v1310_v10  ;;  %v1311_v59 = vmul.f32 0.03125, %v1309_v25 }
 0xf68   :  { %v1313_v60 = vsub.f32 %v1303_v21, %v1311_v59  ;;  %v1314_v6 = vmul.f32 %v1312_v55, %v1312_v55 }
 0xf6a   :  { %v1316_v7 = vsel %vm84_vm1, %v1314_v6, 0.0  ;;  %v1315_v26 = vmul.f32 %v1313_v60, %v1313_v60 }
 0xf6b   :  { %1317 = vadd.xlane.f32.xlu0 %v1316_v7 }
 0xf6c   :  { %v1319_v27 = vsel %vm84_vm1, %v1315_v26, 0.0 }
 0xf6d   :  { %1320 = vadd.xlane.f32.xlu1 %v1319_v27 }
 0xff8   :  { %v1318_v30 = vpop.xlane.xlu0 %1317 }
 0xff9   :  { %v1322_v31 = vmul.f32 0.03125, %v1318_v30 }
 0xffa   :  { %v1321_v32 = vpop.xlane.xlu1 %1320 }
 0xffb   :  { %v1324_v33 = vadd.f32 1e-05, %v1322_v31  ;;  %v1323_v34 = vmul.f32 0.03125, %v1321_v32 }
 0xffd   :  { %3348 = vrsqrt.f32 %v1324_v33  ;;  %v1325_v14 = vadd.f32 1e-05, %v1323_v34 }
 0xfff   :  { %3350 = vrsqrt.f32 %v1325_v14 }
0x1007   :  { %v3349_v39 = vpop.eup %3348 }
0x1008   :  { %v1328_v41 = vmul.f32 %v3349_v39, %v1312_v55 }
0x1009   :  { %v3351_v42 = vpop.eup %3350 }
0x100a   :  { %v1334_v43 = vmul.f32 %v1333_v36, %v1328_v41  ;;  %v1329_v44 = vmul.f32 %v3351_v42, %v1313_v60 }
0x100c   :  { %v1335_v46 = vmul.f32 %v1333_v36, %v1329_v44  ;;  %v3801_v47 = vadd.f32 %v1339_v45, %v1334_v43 }
0x100e   :  { %v3803_v48 = vadd.f32 %v1339_v45, %v1335_v46 }
0x1010   :  { %v1375_v49 = vpack.c.bf16 %v3803_v48, %v3801_v47 }
0x1012   :  { %3091 = vmatmul.mubr.msk.bf16.vlgmr.msra.gmra.mrb[36].mxu0 %vm84_vm1, %v1375_v49 }
0x1013   :  { %3096 = vmatprep.mubr.msk.bf16.mxu0 %vm3417_vm0, %v3416_v1 }
0x10e5   :  { %v1425_v50 = vpop.f32.mrb[36].mxu0 }
0x10e6   :  { %v3810_v51 = vpack.c.bf16 %v1425_v50, %v1425_v50  ;;  %v3092_v52 = vpop.f32.mrb[37].mxu0 }
0x10e7   :  { %v1428_v54 = vpop.f32.mrb[38].mxu0 }
0x10e8   :  { %v3812_v56 = vpack.c.bf16 %v1428_v54, %v1428_v54  ;;  %1435 = vrot.lane.b32.xlu0 %v3810_v51, %s3418_s0  ;;  %v3093_v0 = vpop.f32.mrb[39].mxu0 }
0x10ea   :  { %1484 = vrot.lane.b32.xlu1 %v3812_v56, %s3418_s0 }
0x115a   :  { %v1436_v57 = vpop.permute.xlu0 %1435 }
0x115b   :  { %v1441_v58 = vsel %vm134_vm2, %v1436_v57, 0 }
0x115c   :  { %3095 = vmatpush3.bf16.xpose.msra.mxu0 %v1441_v58  ;;  %v1485_v61 = vpop.permute.xlu1 %1484 }
0x115d   :  { %3100 = vmatprep.subr.bf16.mxu0 %v3416_v1  ;;  %v1490_v62 = vsel %vm134_vm2, %v1485_v61, 0 }
0x1163   :  { %3097 = vmatmul.mubr.msk.bf16.vlgmr.msra.gmra.mrb[40].mxu0 %vm134_vm2, %v3810_v51 }
0x1164   :  { %3101 = vmatpush3.bf16.xpose.msra.mxu0 %v1490_v62  ;;  %3102 = vmatprep.mubr.msk.bf16.mxu0 %vm3417_vm0, %v3416_v1 }
0x1165   :  { %3106 = vmatprep.subr.bf16.mxu0 %v3416_v1 }
0x116b   :  { %3103 = vmatmul.mubr.msk.bf16.vlgmr.msra.gmra.mrb[44].mxu0 %vm134_vm2, %v3812_v56 }
0x116c   :  { %3108 = vmatprep.mubr.msk.bf16.mxu0 %vm3417_vm0, %v3416_v1 }
0x1236   :  { %v1477_v63 = vpop.f32.mrb[40].mxu0 }
0x1237   :  { %v1478_v2 = vadd.f32 %v1477_v63, %v3534_v23  ;;  %v3098_v3 = vpop.f32.mrb[41].mxu0 }
0x1238   :  { %v1480_v4 = vpop.f32.mrb[42].mxu0 }
0x1239   :  { %v3099_v9 = vpop.f32.mrb[43].mxu0  ;;  %v1532_v11 = vsel %vm134_vm2, %v1478_v2, -inf }
0x123a   :  { %1533 = vmax.xlane.f32.xlu1 %v1532_v11 }
0x123e   :  { %v1526_v12 = vpop.f32.mrb[44].mxu0 }
0x123f   :  { %v1527_v13 = vadd.f32 %v1526_v12, %v3534_v23  ;;  %v3104_v15 = vpop.f32.mrb[45].mxu0 }
0x1240   :  { %v1529_v16 = vpop.f32.mrb[46].mxu0 }
0x1241   :  { %v3105_v17 = vpop.f32.mrb[47].mxu0  ;;  %v1535_v18 = vsel %vm134_vm2, %v1527_v13, -inf }
0x1242   :  { %1536 = vmax.xlane.f32.xlu0 %v1535_v18 }
0x124b   :  { %1604 = vrot.lane.b32.xlu1 %v3812_v56, %s3420_s1 }
0x1258   :  { %1556 = vrot.lane.b32.xlu0 %v3810_v51, %s3420_s1 }
0x12c7   :  { %v1534_v19 = vpop.xlane.xlu1 %1533 }
0x12c8   :  { %v1538_v21 = vsub.f32 %v1478_v2, %v1534_v19 }
0x12ca   :  { %v1540_v22 = vmul.f32 1.442695, %v1538_v21 }
0x12cb   :  { %v1605_v24 = vpop.permute.xlu1 %1604 }
0x12cc   :  { %3352 = vpow2.f32 %v1540_v22  ;;  %v1610_v10 = vsel %vm259_vm4, %v1605_v24, 0 }
0x12cd   :  { %3113 = vmatpush3.bf16.msra.mxu1 %v1610_v10 }
0x12ce   :  { %3124 = vmatprep.subr.bf16.mxu1 %v3416_v1 }
0x12cf   :  { %v1537_v25 = vpop.xlane.xlu0 %1536 }
0x12d0   :  { %v1539_v55 = vsub.f32 %v1527_v13, %v1537_v25 }
0x12d2   :  { %v1542_v59 = vmul.f32 1.442695, %v1539_v55 }
0x12d3   :  { %v1557_v60 = vpop.permute.xlu0 %1556 }
0x12d4   :  { %3354 = vpow2.f32 %v1542_v59  ;;  %v1562_v6 = vsel %vm259_vm4, %v1557_v60, 0 }
0x12d5   :  { %3107 = vmatpush3.bf16.msra.mxu0 %v1562_v6 }
0x12d6   :  { %v3353_v7 = vpop.eup %3352  ;;  %3118 = vmatprep.subr.bf16.mxu0 %v3416_v1 }
0x12d7   :  { %v1544_v26 = vsel %vm134_vm2, %v3353_v7, 0.0 }
0x12d8   :  { %1545 = vadd.xlane.f32.xlu0 %v1544_v26 }
0x12de   :  { %v3355_v27 = vpop.eup %3354 }
0x12df   :  { %v1547_v28 = vsel %vm134_vm2, %v3355_v27, 0.0 }
0x12e0   :  { %1548 = vadd.xlane.f32.xlu1 %v1547_v28 }
0x12ee   :  { %1704 = vrot.lane.b32.xlu0 %v3812_v56, %s3421_s15 }
0x12f1   :  { %1654 = vrot.lane.b32.xlu1 %v3810_v51, %s3421_s15  ;;  %s3433_s15 = smov [#allocation2]  }
0x12f2   :  { %1702 = vrot.lane.b32.xlu0 %v3812_v56, %s3422_s16 }
0x12f5   :  { %1652 = vrot.lane.b32.xlu1 %v3810_v51, %s3422_s16  ;;  %s2736_s16 = sshll.u32 %s3433_s15, 4  ;;  %s2737_s16 = int_to_ptr.vmem [resolvable:$true] %s2736_s16 }
0x12f6   :  { %p3397_p1 = scmp.lt.s32.totalorder %s2737_s16, %s2737_s16 }
0x1365   :  { %v1546_v29 = vpop.xlane.xlu0 %1545 }
0x1366   :  { %3356 = vrcp.f32 %v1546_v29 }
0x1369   :  { %v1705_v41 = vpop.permute.xlu0 %1704 }
0x136a   :  { %v1710_v44 = vsel %vm134_vm2, %v1705_v41, 0 }
0x136d   :  { %v1549_v30 = vpop.xlane.xlu1 %1548  ;;  %v1703_v45 = vpop.permute.xlu0 %1702 }
0x136e   :  { %3358 = vrcp.f32 %v1549_v30 }
0x1370   :  { %v3357_v31 = vpop.eup %3356 }
0x1371   :  { %v1552_v32 = vmul.f32 %v3357_v31, %v3353_v7  ;;  %v1655_v33 = vpop.permute.xlu1 %1654 }
0x1372   :  { %v1660_v14 = vsel %vm134_vm2, %v1655_v33, 0 }
0x1373   :  { %v1554_v34 = vpack.c.bf16 %v1552_v32, %v1552_v32 }
0x1375   :  { %3109 = vmatmul.mubr.msk.bf16.vlgmr.msra.gmra.mrb[48].mxu0 %vm134_vm2, %v1554_v34  ;;  %v1653_v43 = vpop.permute.xlu1 %1652 }
0x1376   :  { %3119 = vmatpush3.bf16.xpose.msra.mxu0 %v1660_v14  ;;  %3120 = vmatprep.mubr.msk.bf16.mxu0 %vm3417_vm0, %v3416_v1 }
0x1377   :  { %3130 = vmatprep.subr.bf16.mxu0 %v3416_v1 }
0x1378   :  { %v3359_v36 = vpop.eup %3358 }
0x1379   :  { %v1553_v39 = vmul.f32 %v3359_v36, %v3355_v27 }
0x137b   :  { %v1555_v42 = vpack.c.bf16 %v1553_v39, %v1553_v39 }
0x137d   :  { %3115 = vmatmul.mubr.msk.bf16.vlgmr.msra.gmra.mrb[44].mxu1 %vm134_vm2, %v1555_v42  ;;  %3121 = vmatmul.mubr.msk.bf16.vlgmr.msra.gmra.mrb[52].mxu0 %vm134_vm2, %v1653_v43 }
0x137e   :  { %3125 = vmatpush3.bf16.xpose.msra.mxu1 %v1710_v44  ;;  %3126 = vmatprep.mubr.msk.bf16.mxu1 %vm3417_vm0, %v3416_v1 }
0x137f   :  { %3136 = vmatprep.subr.bf16.mxu1 %v3416_v1  ;;  %3132 = vmatprep.mubr.msk.bf16.mxu0 %vm3417_vm0, %v3416_v1 }
0x1385   :  { %3127 = vmatmul.mubr.msk.bf16.vlgmr.msra.gmra.mrb[48].mxu1 %vm134_vm2, %v1703_v45 }
0x1386   :  { %3138 = vmatprep.mubr.msk.bf16.mxu1 %vm3417_vm0, %v3416_v1 }
0x1448   :  { %v3868_v46 = vpop.f32.mrb[48].mxu0 }
0x1449   :  { %v3110_v49 = vpop.f32.mrb[49].mxu0 }
0x144a   :  { %v1601_v50 = vpop.f32.mrb[50].mxu0 }
0x144b   :  { %v3111_v52 = vpop.f32.mrb[51].mxu0 }
0x1450   :  { %v3870_v54 = vpop.f32.mrb[44].mxu1  ;;  %v1696_v0 = vpop.f32.mrb[52].mxu0 }
0x1451   :  { %v1697_v57 = vadd.f32 %v1696_v0, %v3534_v23  ;;  %v3116_v58 = vpop.f32.mrb[45].mxu1  ;;  %v3122_v61 = vpop.f32.mrb[53].mxu0 }
0x1452   :  { %v1649_v62 = vpop.f32.mrb[46].mxu1  ;;  %v1699_v63 = vpop.f32.mrb[54].mxu0 }
0x1453   :  { %v3117_v2 = vpop.f32.mrb[47].mxu1  ;;  %v3123_v3 = vpop.f32.mrb[55].mxu0  ;;  %v1752_v4 = vsel %vm134_vm2, %v1697_v57, -inf }
0x1454   :  { %1753 = vmax.xlane.f32.xlu1 %v1752_v4 }
0x1458   :  { %v1746_v9 = vpop.f32.mrb[48].mxu1 }
0x1459   :  { %v1747_v11 = vadd.f32 %v1746_v9, %v3534_v23  ;;  %v3128_v12 = vpop.f32.mrb[49].mxu1 }
0x145a   :  { %v1749_v13 = vpop.f32.mrb[50].mxu1 }
0x145b   :  { %v3129_v15 = vpop.f32.mrb[51].mxu1  ;;  %v1755_v16 = vsel %vm134_vm2, %v1747_v11, -inf }
0x145c   :  { %1756 = vmax.xlane.f32.xlu0 %v1755_v16 }
0x1465   :  { %1824 = vrot.lane.b32.xlu1 %v3812_v56, %s3423_s17 }
0x1472   :  { %1776 = vrot.lane.b32.xlu0 %v3810_v51, %s3423_s17  ;;  %s3392_s17 = scalar_lea.vmem %s2737_s16, 32 }
0x1473   :  { %p3393_p0 = scmp.ne.s32.totalorder %s2737_s16, %s3392_s17  ;;  %p3398_p2 = scmp.lt.s32.totalorder %s3392_s17, %s3392_s17 }
0x1475   :  { %p3399_p3 = por %p3398_p2, %p3397_p1 }
0x1477   :  { %p3400_p4 = pnand %p3399_p3, %p3393_p0 }
0x14e1   :  { %v1754_v17 = vpop.xlane.xlu1 %1753 }
0x14e2   :  { %v1758_v18 = vsub.f32 %v1697_v57, %v1754_v17 }
0x14e4   :  { %v1760_v19 = vmul.f32 1.442695, %v1758_v18 }
0x14e5   :  { %v1825_v21 = vpop.permute.xlu1 %1824 }
0x14e6   :  { %3360 = vpow2.f32 %v1760_v19  ;;  %v1830_v22 = vsel %vm259_vm4, %v1825_v21, 0 }
0x14e7   :  { %3137 = vmatpush3.bf16.msra.mxu1 %v1830_v22 }
0x14e8   :  { %3148 = vmatprep.subr.bf16.mxu1 %v3416_v1 }
0x14e9   :  { %v1757_v24 = vpop.xlane.xlu0 %1756 }
0x14ea   :  { %v1759_v10 = vsub.f32 %v1747_v11, %v1757_v24 }
0x14ec   :  { %v1762_v25 = vmul.f32 1.442695, %v1759_v10 }
0x14ed   :  { %v1777_v55 = vpop.permute.xlu0 %1776 }
0x14ee   :  { %3362 = vpow2.f32 %v1762_v25  ;;  %v1782_v59 = vsel %vm259_vm4, %v1777_v55, 0 }
0x14ef   :  { %3131 = vmatpush3.bf16.msra.mxu0 %v1782_v59 }
0x14f0   :  { %v3361_v60 = vpop.eup %3360  ;;  %3142 = vmatprep.subr.bf16.mxu0 %v3416_v1 }
0x14f1   :  { %v1764_v6 = vsel %vm134_vm2, %v3361_v60, 0.0 }
0x14f2   :  { %1765 = vadd.xlane.f32.xlu0 %v1764_v6 }
0x14f8   :  { %v3363_v7 = vpop.eup %3362 }
0x14f9   :  { %v1767_v26 = vsel %vm134_vm2, %v3363_v7, 0.0 }
0x14fa   :  { %1768 = vadd.xlane.f32.xlu1 %v1767_v26 }
0x1508   :  { %1924 = vrot.lane.b32.xlu0 %v3812_v56, %s3424_s18 }
0x150b   :  { %1874 = vrot.lane.b32.xlu1 %v3810_v51, %s3424_s18 }
0x150c   :  { %1922 = vrot.lane.b32.xlu0 %v3812_v56, %s3425_s19 }
0x150f   :  { %1872 = vrot.lane.b32.xlu1 %v3810_v51, %s3425_s19 }
0x157f   :  { %v1766_v27 = vpop.xlane.xlu0 %1765 }
0x1580   :  { %3364 = vrcp.f32 %v1766_v27 }
0x1583   :  { %v1925_v36 = vpop.permute.xlu0 %1924 }
0x1584   :  { %v1930_v42 = vsel %vm134_vm2, %v1925_v36, 0 }
0x1587   :  { %v1769_v28 = vpop.xlane.xlu1 %1768  ;;  %v1923_v43 = vpop.permute.xlu0 %1922 }
0x1588   :  { %3366 = vrcp.f32 %v1769_v28 }
0x158a   :  { %v3365_v29 = vpop.eup %3364 }
0x158b   :  { %v1772_v30 = vmul.f32 %v3365_v29, %v3361_v60  ;;  %v1875_v31 = vpop.permute.xlu1 %1874 }
0x158c   :  { %v1880_v33 = vsel %vm134_vm2, %v1875_v31, 0 }
0x158d   :  { %v1774_v32 = vpack.c.bf16 %v1772_v30, %v1772_v30 }
0x158f   :  { %3133 = vmatmul.mubr.msk.bf16.vlgmr.msra.gmra.mrb[56].mxu0 %vm134_vm2, %v1774_v32  ;;  %v1873_v41 = vpop.permute.xlu1 %1872 }
0x1590   :  { %3143 = vmatpush3.bf16.xpose.msra.mxu0 %v1880_v33  ;;  %3144 = vmatprep.mubr.msk.bf16.mxu0 %vm3417_vm0, %v3416_v1 }
0x1591   :  { %3154 = vmatprep.subr.bf16.mxu0 %v3416_v1 }
0x1592   :  { %v3367_v34 = vpop.eup %3366 }
0x1593   :  { %v1773_v14 = vmul.f32 %v3367_v34, %v3363_v7 }
0x1595   :  { %v1775_v39 = vpack.c.bf16 %v1773_v14, %v1773_v14 }
0x1597   :  { %3139 = vmatmul.mubr.msk.bf16.vlgmr.msra.gmra.mrb[52].mxu1 %vm134_vm2, %v1775_v39  ;;  %3145 = vmatmul.mubr.msk.bf16.vlgmr.msra.gmra.mrb[60].mxu0 %vm134_vm2, %v1873_v41 }
0x1598   :  { %3149 = vmatpush3.bf16.xpose.msra.mxu1 %v1930_v42  ;;  %3150 = vmatprep.mubr.msk.bf16.mxu1 %vm3417_vm0, %v3416_v1 }
0x1599   :  { %3160 = vmatprep.subr.bf16.mxu1 %v3416_v1  ;;  %3156 = vmatprep.mubr.msk.bf16.mxu0 %vm3417_vm0, %v3416_v1 }
0x159f   :  { %3151 = vmatmul.mubr.msk.bf16.vlgmr.msra.gmra.mrb[56].mxu1 %vm134_vm2, %v1923_v43 }
0x15a0   :  { %3162 = vmatprep.mubr.msk.bf16.mxu1 %vm3417_vm0, %v3416_v1 }
0x1662   :  { %v3910_v44 = vpop.f32.mrb[56].mxu0 }
0x1663   :  { %v3134_v45 = vpop.f32.mrb[57].mxu0 }
0x1664   :  { %v1821_v49 = vpop.f32.mrb[58].mxu0 }
0x1665   :  { %v3135_v50 = vpop.f32.mrb[59].mxu0 }
0x166a   :  { %v3912_v52 = vpop.f32.mrb[52].mxu1  ;;  %v1916_v0 = vpop.f32.mrb[60].mxu0 }
0x166b   :  { %v3267_v57 = vpack.i.bf16 %v3912_v52, %v3910_v44  ;;  %v1917_v58 = vadd.f32 %v1916_v0, %v3534_v23  ;;  %v3140_v61 = vpop.f32.mrb[53].mxu1  ;;  %v3146_v62 = vpop.f32.mrb[61].mxu0 }
0x166c   :  { %v1869_v63 = vpop.f32.mrb[54].mxu1  ;;  %v1919_v2 = vpop.f32.mrb[62].mxu0 }
0x166d   :  { %v3141_v3 = vpop.f32.mrb[55].mxu1  ;;  %v3147_v4 = vpop.f32.mrb[63].mxu0  ;;  %v1972_v9 = vsel %vm134_vm2, %v1917_v58, -inf }
0x166e   :  { %1973 = vmax.xlane.f32.xlu1 %v1972_v9 }
0x1672   :  { %v1966_v11 = vpop.f32.mrb[56].mxu1 }
0x1673   :  { %v1967_v12 = vadd.f32 %v1966_v11, %v3534_v23  ;;  %v3152_v13 = vpop.f32.mrb[57].mxu1 }
0x1674   :  { %v1969_v15 = vpop.f32.mrb[58].mxu1 }
0x1675   :  { %v3153_v16 = vpop.f32.mrb[59].mxu1  ;;  %v1975_v17 = vsel %vm134_vm2, %v1967_v12, -inf }
0x1676   :  { %1976 = vmax.xlane.f32.xlu0 %v1975_v17 }
0x167f   :  { %2044 = vrot.lane.b32.xlu1 %v3812_v56, %s3426_s20 }
0x168c   :  { %1996 = vrot.lane.b32.xlu0 %v3810_v51, %s3426_s20 }
0x16fb   :  { %v1974_v18 = vpop.xlane.xlu1 %1973 }
0x16fc   :  { %v1978_v19 = vsub.f32 %v1917_v58, %v1974_v18 }
0x16fe   :  { %v1980_v21 = vmul.f32 1.442695, %v1978_v19 }
0x16ff   :  { %v2045_v22 = vpop.permute.xlu1 %2044 }
0x1700   :  { %3368 = vpow2.f32 %v1980_v21  ;;  %v2050_v24 = vsel %vm259_vm4, %v2045_v22, 0 }
0x1701   :  { %3161 = vmatpush3.bf16.msra.mxu1 %v2050_v24 }
0x1702   :  { %3172 = vmatprep.subr.bf16.mxu1 %v3416_v1 }
0x1703   :  { %v1977_v10 = vpop.xlane.xlu0 %1976 }
0x1704   :  { %v1979_v25 = vsub.f32 %v1967_v12, %v1977_v10 }
0x1706   :  { %v1982_v55 = vmul.f32 1.442695, %v1979_v25 }
0x1707   :  { %v1997_v59 = vpop.permute.xlu0 %1996 }
0x1708   :  { %3370 = vpow2.f32 %v1982_v55  ;;  %v2002_v60 = vsel %vm259_vm4, %v1997_v59, 0 }
0x1709   :  { %3155 = vmatpush3.bf16.msra.mxu0 %v2002_v60 }
0x170a   :  { %v3369_v6 = vpop.eup %3368  ;;  %3166 = vmatprep.subr.bf16.mxu0 %v3416_v1 }
0x170b   :  { %v1984_v7 = vsel %vm134_vm2, %v3369_v6, 0.0 }
0x170c   :  { %1985 = vadd.xlane.f32.xlu0 %v1984_v7 }
0x1712   :  { %v3371_v26 = vpop.eup %3370 }
0x1713   :  { %v1987_v27 = vsel %vm134_vm2, %v3371_v26, 0.0 }
0x1714   :  { %1988 = vadd.xlane.f32.xlu1 %v1987_v27 }
0x1722   :  { %2144 = vrot.lane.b32.xlu0 %v3812_v56, %s3427_s21 }
0x1725   :  { %2094 = vrot.lane.b32.xlu1 %v3810_v51, %s3427_s21 }
0x1726   :  { %2142 = vrot.lane.b32.xlu0 %v3812_v56, %s3428_s22 }
0x1729   :  { %2092 = vrot.lane.b32.xlu1 %v3810_v51, %s3428_s22 }
0x1799   :  { %v1986_v28 = vpop.xlane.xlu0 %1985 }
0x179a   :  { %3372 = vrcp.f32 %v1986_v28 }
0x179d   :  { %v2145_v39 = vpop.permute.xlu0 %2144 }
0x179e   :  { %v2150_v43 = vsel %vm134_vm2, %v2145_v39, 0 }
0x17a1   :  { %v1989_v29 = vpop.xlane.xlu1 %1988  ;;  %v2143_v45 = vpop.permute.xlu0 %2142 }
0x17a2   :  { %3374 = vrcp.f32 %v1989_v29 }
0x17a4   :  { %v3373_v30 = vpop.eup %3372 }
0x17a5   :  { %v1992_v31 = vmul.f32 %v3373_v30, %v3369_v6  ;;  %v2095_v32 = vpop.permute.xlu1 %2094 }
0x17a6   :  { %v2100_v34 = vsel %vm134_vm2, %v2095_v32, 0 }
0x17a7   :  { %v1994_v33 = vpack.c.bf16 %v1992_v31, %v1992_v31 }
0x17a9   :  { %3157 = vmatmul.mubr.msk.bf16.vlgmr.msra.gmra.mrb[64].mxu0 %vm134_vm2, %v1994_v33  ;;  %v2093_v42 = vpop.permute.xlu1 %2092 }
0x17aa   :  { %3167 = vmatpush3.bf16.xpose.msra.mxu0 %v2100_v34  ;;  %3168 = vmatprep.mubr.msk.bf16.mxu0 %vm3417_vm0, %v3416_v1  ;;  %v3298_v34 = vld [vmem:[%s4105_s3 + $0x50] sm:$0xff]  }
0x17ab   :  { %3178 = vmatprep.subr.bf16.mxu0 %v3416_v1 }
0x17ac   :  { %v3375_v14 = vpop.eup %3374 }
0x17ad   :  { %v1993_v36 = vmul.f32 %v3375_v14, %v3371_v26  ;;  %v3299_v14 = vld [vmem:[%s4105_s3 + $0x58] sm:$0xff]  }
0x17af   :  { %v1995_v41 = vpack.c.bf16 %v1993_v36, %v1993_v36 }
0x17b1   :  { %3163 = vmatmul.mubr.msk.bf16.vlgmr.msra.gmra.mrb[60].mxu1 %vm134_vm2, %v1995_v41  ;;  %3169 = vmatmul.mubr.msk.bf16.vlgmr.msra.gmra.mrb[68].mxu0 %vm134_vm2, %v2093_v42 }
0x17b2   :  { %3173 = vmatpush3.bf16.xpose.msra.mxu1 %v2150_v43  ;;  %3174 = vmatprep.mubr.msk.bf16.mxu1 %vm3417_vm0, %v3416_v1 }
0x17b3   :  { %3184 = vmatprep.subr.bf16.mxu1 %v3416_v1  ;;  %3180 = vmatprep.mubr.msk.bf16.mxu0 %vm3417_vm0, %v3416_v1 }
0x17b9   :  { %3175 = vmatmul.mubr.msk.bf16.vlgmr.msra.gmra.mrb[64].mxu1 %vm134_vm2, %v2143_v45 }
0x17ba   :  { %3186 = vmatprep.mubr.msk.bf16.mxu1 %vm3417_vm0, %v3416_v1 }
0x187c   :  { %v2038_v49 = vpop.f32.mrb[64].mxu0 }
0x187d   :  { %v3158_v50 = vpop.f32.mrb[65].mxu0 }
0x187e   :  { %v2041_v0 = vpop.f32.mrb[66].mxu0 }
0x187f   :  { %v3159_v58 = vpop.f32.mrb[67].mxu0 }
0x1884   :  { %v2086_v61 = vpop.f32.mrb[60].mxu1  ;;  %v2136_v62 = vpop.f32.mrb[68].mxu0 }
0x1885   :  { %v3272_v63 = vpack.i.bf16 %v2086_v61, %v2038_v49  ;;  %v2137_v2 = vadd.f32 %v2136_v62, %v3534_v23  ;;  %v3164_v3 = vpop.f32.mrb[61].mxu1  ;;  %v3170_v4 = vpop.f32.mrb[69].mxu0 }
0x1886   :  { %v2089_v9 = vpop.f32.mrb[62].mxu1  ;;  %v2139_v11 = vpop.f32.mrb[70].mxu0 }
0x1887   :  { %v3165_v12 = vpop.f32.mrb[63].mxu1  ;;  %v3171_v13 = vpop.f32.mrb[71].mxu0  ;;  %v2192_v15 = vsel %vm134_vm2, %v2137_v2, -inf }
0x1888   :  { %2193 = vmax.xlane.f32.xlu1 %v2192_v15 }
0x188c   :  { %v2186_v16 = vpop.f32.mrb[64].mxu1 }
0x188d   :  { %v2187_v17 = vadd.f32 %v2186_v16, %v3534_v23  ;;  %v3176_v18 = vpop.f32.mrb[65].mxu1 }
0x188e   :  { %v2189_v19 = vpop.f32.mrb[66].mxu1 }
0x188f   :  { %v3177_v21 = vpop.f32.mrb[67].mxu1  ;;  %v2195_v22 = vsel %vm134_vm2, %v2187_v17, -inf }
0x1890   :  { %2196 = vmax.xlane.f32.xlu0 %v2195_v22 }
0x1915   :  { %v2194_v24 = vpop.xlane.xlu1 %2193 }
0x1916   :  { %v2198_v10 = vsub.f32 %v2137_v2, %v2194_v24 }
0x1918   :  { %v2200_v25 = vmul.f32 1.442695, %v2198_v10 }
0x191a   :  { %3376 = vpow2.f32 %v2200_v25 }
0x191d   :  { %v2197_v55 = vpop.xlane.xlu0 %2196 }
0x191e   :  { %v2199_v59 = vsub.f32 %v2187_v17, %v2197_v55 }
0x1920   :  { %v2202_v60 = vmul.f32 1.442695, %v2199_v59 }
0x1922   :  { %3378 = vpow2.f32 %v2202_v60 }
0x1924   :  { %v3377_v6 = vpop.eup %3376 }
0x1925   :  { %v2204_v7 = vsel %vm134_vm2, %v3377_v6, 0.0 }
0x1926   :  { %2205 = vadd.xlane.f32.xlu0 %v2204_v7 }
0x192c   :  { %v3379_v26 = vpop.eup %3378 }
0x192d   :  { %v2207_v23 = vsel %vm134_vm2, %v3379_v26, 0.0 }
0x192e   :  { %2208 = vadd.xlane.f32.xlu1 %v2207_v23 }
0x193c   :  { %2216 = vrot.lane.b32.xlu0 %v3810_v51, %s3429_s23 }
0x193f   :  { %2264 = vrot.lane.b32.xlu1 %v3812_v56, %s3429_s23 }
0x1940   :  { %3273 = vrot.lane.b32.xlu0 %v3272_v63, %s3431_s25 }
0x1943   :  { %3268 = vrot.lane.b32.xlu1 %v3267_v57, %s3430_s24 }
0x19b3   :  { %v2206_v27 = vpop.xlane.xlu0 %2205 }
0x19b4   :  { %3380 = vrcp.f32 %v2206_v27 }
0x19b7   :  { %v2217_v28 = vpop.permute.xlu0 %2216 }
0x19b8   :  { %v2222_v29 = vsel %vm259_vm4, %v2217_v28, 0 }
0x19b9   :  { %3179 = vmatpush3.bf16.msra.mxu0 %v2222_v29 }
0x19ba   :  { %3190 = vmatprep.subr.bf16.mxu0 %v3416_v1 }
0x19bb   :  { %v2209_v30 = vpop.xlane.xlu1 %2208  ;;  %v3274_v63 = vpop.permute.xlu0 %3273 }
0x19bc   :  { %3382 = vrcp.f32 %v2209_v30  ;;  %v3276_v4 = vunpack.i.h.bf16 %v3274_v63  ;;  %v3275_v9 = vunpack.i.l.bf16 %v3274_v63 }
0x19be   :  { %v3381_v51 = vpop.eup %3380 }
0x19bf   :  { %v2212_v31 = vmul.f32 %v3381_v51, %v3377_v6  ;;  %v2265_v56 = vpop.permute.xlu1 %2264 }
0x19c0   :  { %v2270_v32 = vsel %vm259_vm4, %v2265_v56, 0  ;;  %v3301_v56 = vld [vmem:[%s4106_s4 + $0x18] sm:$0xff]  }
0x19c1   :  { %3185 = vmatpush3.bf16.msra.mxu1 %v2270_v32  ;;  %v2214_v33 = vpack.c.bf16 %v2212_v31, %v2212_v31  ;;  %v3302_v32 = vld [vmem:[%s4105_s3 + $0x60] sm:$0xff]  }
0x19c2   :  { %3198 = vmatprep.subr.bf16.mxu1 %v3416_v1 }
0x19c3   :  { %3181 = vmatmul.mubr.msk.bf16.vlgmr.msra.gmra.mrb[72].mxu0 %vm134_vm2, %v2214_v33  ;;  %v3269_v58 = vpop.permute.xlu1 %3268  ;;  %v3303_v33 = vld [vmem:[%s4105_s3 + $0x68] sm:$0xff]  }
0x19c4   :  { %3194 = vmatprep.mubr.msk.bf16.mxu0 %vm3417_vm0, %v3416_v1  ;;  %3191 = vmatpush3.bf16.msra.mxu0 %v3298_v34  ;;  %v3271_v61 = vunpack.i.h.bf16 %v3269_v58  ;;  %v3270_v62 = vunpack.i.l.bf16 %v3269_v58  ;;  %v3307_v34 = vld [vmem:[%s4105_s3 + $0x88] sm:$0xff]  }
0x19c5   :  { %3192 = vmatprep.subr.bf16.mxu0 %v3416_v1 }
0x19c6   :  { %v3383_v44 = vpop.eup %3382  ;;  %v2337_v2 = vsel %vm134_vm2, %v3870_v54, %v3271_v61  ;;  %v2336_v3 = vsel %vm134_vm2, %v3868_v46, %v3270_v62  ;;  %v4002_v46 = vld [vmem:[%s4107_s5 + $0x8] sm:$0xff] }
0x19c7   :  { %v2213_v52 = vmul.f32 %v3383_v44, %v3379_v26  ;;  %v2338_v15 = vsel %vm1037_vm5, %v2336_v3, %v3275_v9  ;;  %v2339_v16 = vsel %vm1037_vm5, %v2337_v2, %v3276_v4  ;;  %v2346_v54 = vrot.slane %v4002_v46, %v1046_v5  ;;  %v3304_v44 = vld [vmem:[%s4105_s3 + $0x70] sm:$0xff]  }
0x19c8   :  { %3193 = vmatpush3.bf16.msra.mxu0 %v3299_v14  ;;  %v2440_v62 = vrot.slane %v4002_v46, %v1141_v40  ;;  %v3309_v40 = vld [vmem:[%s4105_s3 + $0x98] sm:$0xff]   ;;  %v2447_v9 = vrot.slane %v4002_v46, %v1148_v53 }
0x19c9   :  { %v2215_v57 = vpack.c.bf16 %v2213_v52, %v2213_v52  ;;  %3206 = vmatprep.subr.bf16.mxu0 %v3416_v1  ;;  %v3305_v52 = vld [vmem:[%s4105_s3 + $0x78] sm:$0xff]  }
0x19cb   :  { %3187 = vmatmul.mubr.msk.bf16.vlgmr.msra.gmra.mrb[68].mxu1 %vm134_vm2, %v2215_v57  ;;  %v3306_v57 = vld [vmem:[%s4105_s3 + $0x80] sm:$0xff]  }
0x19cc   :  { %3202 = vmatprep.mubr.msk.bf16.mxu1 %vm3417_vm0, %v3416_v1 }
0x1a96   :  { %v2258_v36 = vpop.f32.mrb[72].mxu0 }
0x1a97   :  { %v3182_v39 = vpop.f32.mrb[73].mxu0 }
0x1a98   :  { %v2261_v41 = vpop.f32.mrb[74].mxu0 }
0x1a99   :  { %v3183_v42 = vpop.f32.mrb[75].mxu0 }
0x1a9e   :  { %v2306_v43 = vpop.f32.mrb[68].mxu1 }
0x1a9f   :  { %v3277_v45 = vpack.i.bf16 %v2306_v43, %v2258_v36  ;;  %v3188_v49 = vpop.f32.mrb[69].mxu1 }
0x1aa0   :  { %v2309_v50 = vpop.f32.mrb[70].mxu1  ;;  %v2434_v49 = vrot.slane %v4002_v46, %v1135_v38  ;;  %v3308_v38 = vld [vmem:[%s4105_s3 + $0x90] sm:$0xff]  }
0x1aa1   :  { %3278 = vrot.lane.b32.xlu1 %v3277_v45, %s3432_s30  ;;  %v3189_v0 = vpop.f32.mrb[71].mxu1 }
0x1b13   :  { %v3279_v11 = vpop.permute.xlu1 %3278 }
0x1b14   :  { %v3281_v12 = vunpack.i.h.bf16 %v3279_v11  ;;  %v3280_v13 = vunpack.i.l.bf16 %v3279_v11 }
0x1b16   :  { %v2341_v17 = vsel %vm1040_vm6, %v2339_v16, %v3281_v12  ;;  %v2340_v18 = vsel %vm1040_vm6, %v2338_v15, %v3280_v13 }
0x1b17   :  { %v2342_v19 = vpack.c.bf16 %v2341_v17, %v2340_v18 }
0x1b19   :  { %3195 = vmatmul.mubr.msk.bf16.vlgmr.msra.gmra.mrb[76].mxu0 %vm84_vm1, %v2342_v19 }
0x1b1a   :  { %3222 = vmatprep.mubr.msk.bf16.mxu0 %vm3417_vm0, %v3416_v1  ;;  %3207 = vmatpush3.bf16.msra.mxu0 %v3302_v32 }
0x1b1b   :  { %3208 = vmatprep.subr.bf16.mxu0 %v3416_v1 }
0x1b1e   :  { %3209 = vmatpush3.bf16.msra.mxu0 %v3303_v33 }
0x1b1f   :  { %3210 = vmatprep.subr.bf16.mxu0 %v3416_v1 }
0x1b22   :  { %3211 = vmatpush3.bf16.msra.mxu0 %v3304_v44 }
0x1b23   :  { %3212 = vmatprep.subr.bf16.mxu0 %v3416_v1 }
0x1b26   :  { %3213 = vmatpush3.bf16.msra.mxu0 %v3305_v52 }
0x1b27   :  { %3214 = vmatprep.subr.bf16.mxu0 %v3416_v1 }
0x1b2a   :  { %3215 = vmatpush3.bf16.msra.mxu0 %v3306_v57 }
0x1b2b   :  { %3216 = vmatprep.subr.bf16.mxu0 %v3416_v1 }
0x1b2e   :  { %3217 = vmatpush3.bf16.msra.mxu0 %v3307_v34  ;;  %v2631_v34 = vrot.slane %v4002_v46, %v1332_v35 }
0x1b2f   :  { %3218 = vmatprep.subr.bf16.mxu0 %v3416_v1 }
0x1b32   :  { %3219 = vmatpush3.bf16.msra.mxu0 %v3308_v38 }
0x1b33   :  { %3220 = vmatprep.subr.bf16.mxu0 %v3416_v1 }
0x1b36   :  { %3221 = vmatpush3.bf16.msra.mxu0 %v3309_v40 }
0x1bec   :  { %v2396_v21 = vpop.f32.mrb[76].mxu0 }
0x1bed   :  { %v2397_v22 = vadd.f32 %v2396_v21, %v2346_v54  ;;  %v3196_v24 = vpop.f32.mrb[77].mxu0  ;;  %v2510_v21 = vrot.slane %v4002_v46, %v1211_v8 }
0x1bee   :  { %v2399_v10 = vpop.f32.mrb[78].mxu0 }
0x1bef   :  { %v2400_v25 = vadd.f32 %v2399_v10, %v2346_v54  ;;  %v3197_v55 = vpop.f32.mrb[79].mxu0  ;;  %v2403_v59 = vadd.f32 %v2397_v22, %v3801_v47 }
0x1bf1   :  { %v2404_v60 = vadd.f32 %v2400_v25, %v3803_v48  ;;  %v2405_v6 = vsel %vm84_vm1, %v2403_v59, 0.0  ;;  %v3300_v48 = vld [vmem:[%s4106_s4 + $0x10] sm:$0xff]  }
0x1bf2   :  { %2406 = vadd.xlane.f32.xlu0 %v2405_v6  ;;  %3199 = vmatpush3.bf16.msra.mxu1 %v3300_v48  ;;  %v3311_v48 = vld [vmem:[%s4108_s6 + $0x8] sm:$0xff]  }
0x1bf3   :  { %v2408_v7 = vsel %vm84_vm1, %v2404_v60, 0.0  ;;  %3200 = vmatprep.subr.bf16.mxu1 %v3416_v1 }
0x1bf4   :  { %2409 = vadd.xlane.f32.xlu1 %v2408_v7 }
0x1bf6   :  { %3201 = vmatpush3.bf16.msra.mxu1 %v3301_v56 }
0x1bf7   :  { %3226 = vmatprep.subr.bf16.mxu1 %v3416_v1 }
0x1c7f   :  { %v2407_v26 = vpop.xlane.xlu0 %2406 }
0x1c80   :  { %v2411_v23 = vmul.f32 0.03125, %v2407_v26 }
0x1c81   :  { %v2410_v27 = vpop.xlane.xlu1 %2409 }
0x1c82   :  { %v2413_v5 = vsub.f32 %v2403_v59, %v2411_v23  ;;  %v2412_v28 = vmul.f32 0.03125, %v2410_v27 }
0x1c84   :  { %v2414_v29 = vsub.f32 %v2404_v60, %v2412_v28  ;;  %v2415_v30 = vmul.f32 %v2413_v5, %v2413_v5 }
0x1c86   :  { %v2417_v51 = vsel %vm84_vm1, %v2415_v30, 0.0  ;;  %v2416_v31 = vmul.f32 %v2414_v29, %v2414_v29 }
0x1c87   :  { %2418 = vadd.xlane.f32.xlu0 %v2417_v51 }
0x1c88   :  { %v2420_v47 = vsel %vm84_vm1, %v2416_v31, 0.0 }
0x1c8b   :  { %2421 = vadd.xlane.f32.xlu0 %v2420_v47  ;;  %v3310_v47 = vld [vmem:[%s4108_s6] sm:$0xff]  }
0x1d14   :  { %v2419_v14 = vpop.xlane.xlu0 %2418 }
0x1d15   :  { %v2423_v36 = vmul.f32 0.03125, %v2419_v14 }
0x1d17   :  { %v2425_v39 = vadd.f32 1e-05, %v2423_v36  ;;  %v2637_v36 = vrot.slane %v4002_v46, %v1338_v37 }
0x1d18   :  { %v2422_v41 = vpop.xlane.xlu0 %2421 }
0x1d19   :  { %3384 = vrsqrt.f32 %v2425_v39  ;;  %v2424_v42 = vmul.f32 0.03125, %v2422_v41 }
0x1d1b   :  { %v2426_v43 = vadd.f32 1e-05, %v2424_v42 }
0x1d1d   :  { %3386 = vrsqrt.f32 %v2426_v43 }
0x1d23   :  { %v3385_v45 = vpop.eup %3384 }
0x1d24   :  { %v2429_v50 = vmul.f32 %v3385_v45, %v2413_v5 }
0x1d26   :  { %v2435_v58 = vmul.f32 %v2434_v49, %v2429_v50 }
0x1d27   :  { %v3387_v0 = vpop.eup %3386 }
0x1d28   :  { %v2430_v61 = vmul.f32 %v3387_v0, %v2414_v29  ;;  %v2441_v2 = vadd.f32 %v2440_v62, %v2435_v58 }
0x1d2a   :  { %v2436_v63 = vmul.f32 %v2434_v49, %v2430_v61 }
0x1d2c   :  { %v2442_v3 = vadd.f32 %v2440_v62, %v2436_v63 }
0x1d2e   :  { %v2443_v4 = vpack.c.bf16 %v2442_v3, %v2441_v2 }
0x1d30   :  { %3203 = vmatmul.mubr.msk.bf16.vlgmr.msra.gmra.mrb[72].mxu1 %vm84_vm1, %v2443_v4 }
0x1d31   :  { %3230 = vmatprep.mubr.msk.bf16.mxu1 %vm3417_vm0, %v3416_v1  ;;  %3227 = vmatpush3.bf16.msra.mxu1 %v3310_v47 }
0x1d32   :  { %3228 = vmatprep.subr.bf16.mxu1 %v3416_v1 }
0x1d35   :  { %3229 = vmatpush3.bf16.msra.mxu1 %v3311_v48 }
0x1e03   :  { %v2497_v11 = vpop.f32.mrb[72].mxu1 }
0x1e04   :  { %v2498_v12 = vadd.f32 %v2497_v11, %v2447_v9  ;;  %v3204_v13 = vpop.f32.mrb[73].mxu1 }
0x1e05   :  { %v2500_v15 = vpop.f32.mrb[74].mxu1 }
0x1e06   :  { %v2501_v16 = vadd.f32 %v2500_v15, %v2447_v9  ;;  %v3205_v17 = vpop.f32.mrb[75].mxu1  ;;  %v2504_v18 = vmax.f32 %v2498_v12, 0.0 }
0x1e08   :  { %v2505_v19 = vmax.f32 %v2501_v16, 0.0  ;;  %v2839_v16 = vld [vmem:[%s4109_s7] ss:$0 sm:$0xff] }
0x1e0a   :  { %v2506_v54 = vpack.c.bf16 %v2505_v19, %v2504_v18 }
0x1e0c   :  { %3223 = vmatmul.mubr.bf16.vlgmr.msra.gmra.mrb[80].mxu0 %v2506_v54 }
0x1edf   :  { %v2593_v22 = vpop.f32.mrb[80].mxu0 }
0x1ee0   :  { %v2594_v24 = vadd.f32 %v2593_v22, %v2510_v21  ;;  %v3224_v10 = vpop.f32.mrb[81].mxu0 }
0x1ee1   :  { %v2596_v25 = vpop.f32.mrb[82].mxu0 }
0x1ee2   :  { %v2600_v55 = vadd.f32 %v2594_v24, %v2441_v2  ;;  %v2597_v53 = vadd.f32 %v2596_v25, %v2510_v21  ;;  %v3225_v59 = vpop.f32.mrb[83].mxu0 }
0x1ee4   :  { %v2602_v60 = vsel %vm84_vm1, %v2600_v55, 0.0  ;;  %v2601_v6 = vadd.f32 %v2597_v53, %v2442_v3 }
0x1ee5   :  { %2603 = vadd.xlane.f32.xlu1 %v2602_v60 }
0x1ee6   :  { %v2605_v7 = vsel %vm84_vm1, %v2601_v6, 0.0 }
0x1ee7   :  { %2606 = vadd.xlane.f32.xlu0 %v2605_v7 }
0x1f72   :  { %v2604_v26 = vpop.xlane.xlu1 %2603 }
0x1f73   :  { %v2608_v23 = vmul.f32 0.03125, %v2604_v26 }
0x1f74   :  { %v2607_v27 = vpop.xlane.xlu0 %2606 }
0x1f75   :  { %v2610_v5 = vsub.f32 %v2600_v55, %v2608_v23  ;;  %v2609_v28 = vmul.f32 0.03125, %v2607_v27 }
0x1f77   :  { %v2611_v8 = vsub.f32 %v2601_v6, %v2609_v28  ;;  %v2612_v29 = vmul.f32 %v2610_v5, %v2610_v5 }
0x1f79   :  { %v2614_v30 = vsel %vm84_vm1, %v2612_v29, 0.0  ;;  %v2613_v51 = vmul.f32 %v2611_v8, %v2611_v8 }
0x1f7a   :  { %2615 = vadd.xlane.f32.xlu1 %v2614_v30 }
0x1f7b   :  { %v2617_v31 = vsel %vm84_vm1, %v2613_v51, 0.0 }
0x1f7c   :  { %2618 = vadd.xlane.f32.xlu0 %v2617_v31 }
0x2007   :  { %v2616_v56 = vpop.xlane.xlu1 %2615 }
0x2008   :  { %v2620_v32 = vmul.f32 0.03125, %v2616_v56 }
0x2009   :  { %v2619_v33 = vpop.xlane.xlu0 %2618 }
0x200a   :  { %v2622_v44 = vadd.f32 1e-05, %v2620_v32  ;;  %v2621_v52 = vmul.f32 0.03125, %v2619_v33 }
0x200c   :  { %3388 = vrsqrt.f32 %v2622_v44  ;;  %v2623_v57 = vadd.f32 1e-05, %v2621_v52 }
0x200e   :  { %3390 = vrsqrt.f32 %v2623_v57 }
0x2016   :  { %v3389_v14 = vpop.eup %3388 }
0x2017   :  { %v2626_v39 = vmul.f32 %v3389_v14, %v2610_v5 }
0x2018   :  { %v3391_v1 = vpop.eup %3390 }
0x2019   :  { %v2632_v41 = vmul.f32 %v2631_v34, %v2626_v39  ;;  %v2627_v42 = vmul.f32 %v3391_v1, %v2611_v8 }
0x201b   :  { %v2638_v43 = vadd.f32 %v2637_v36, %v2632_v41  ;;  %v2633_v45 = vmul.f32 %v2631_v34, %v2627_v42 }
0x201d   :  { %v2640_v49 = vsel %vm84_vm1, %v2638_v43, -inf  ;;  %v2639_v50 = vadd.f32 %v2637_v36, %v2633_v45 }
0x201e   :  { %v2641_v0 = vrot.slane %v2640_v49, 4 }
0x201f   :  { %v2647_v58 = vsel %vm84_vm1, %v2639_v50, -inf }
0x2020   :  { %v2642_v61 = vmax.f32 %v2640_v49, %v2641_v0  ;;  %v2648_v62 = vrot.slane %v2647_v58, 4 }
0x2022   :  { %v2643_v35 = vrot.slane %v2642_v61, 2  ;;  %v2649_v63 = vmax.f32 %v2647_v58, %v2648_v62 }
0x2024   :  { %v2650_v2 = vrot.slane %v2649_v63, 2  ;;  %v2644_v20 = vmax.f32 %v2642_v61, %v2643_v35 }
0x2026   :  { %v2645_v3 = vrot.slane %v2644_v20, 1  ;;  %v2651_v37 = vmax.f32 %v2649_v63, %v2650_v2 }
0x2028   :  { %v2646_v46 = vmax.f32 %v2644_v20, %v2645_v3  ;;  %v2652_v4 = vrot.slane %v2651_v37, 1 }
0x202a   :  { %v2653_v38 = vmax.f32 %v2651_v37, %v2652_v4  ;;  %v2654_v40 = vpack.c.bf16 %v2646_v46, %v2646_v46 }
0x202c   :  { %v2655_v9 = vpack.c.bf16 %v2653_v38, %v2653_v38  ;;  %v2669_v11 = vunpack.c.l.b16 %v2654_v40 }
0x202e   :  { %v2670_v12 = vunpack.c.l.b16 %v2655_v9 }
0x2030   :  { %v2672_v13 = vsel %vm2671_vm7, %v2670_v12, %v2669_v11 }
0x2031   :  { %v2673_v15 = vpack.c.b16 %v2672_v13, %v2672_v13 }
0x2033   :  { %3231 = vmatmul.mubr.msk.bf16.vlgmr.msra.gmra.mrb[76].mxu1 %vm84_vm1, %v2673_v15 }
0x2106   :  { %v2723_v17 = vpop.f32.mrb[76].mxu1 }
0x2107   :  { %v2724_v18 = vadd.f32 %v2839_v16, %v2723_v17  ;;  %v3232_v19 = vpop.f32.mrb[77].mxu1 }
0x2108   :  { %v2726_v54 = vpop.f32.mrb[78].mxu1 }
0x2109   :  { %2729 = vst [vmem:[#allocation2] sm:$0x3] %v2724_v18  ;;  %v3233_v21 = vpop.f32.mrb[79].mxu1 }
0x210a   :  { %3403 = shalt.err (!%p3400_p4)
}
0x210b   :  { %s3404_s7 = scalar_lea.hbm %s4110_s8, 32 }
0x210c   :  { %p3405_p5 = scmp.ne.s32.totalorder %s4110_s8, %s3404_s7  ;;  %p3408_p6 = scmp.lt.u32.totalorder %s3404_s7, %s4110_s8 }
0x210e   :  { %p3410_p7 = pnand %p3408_p6, %p3405_p5 }
0x2110   :  { %3413 = shalt.err (!%p3410_p7)
}
0x2111   :  { %2739 = dma.vmem_to_hbm [thread:$0]  %s2737_s16, 32, %s4110_s8, [#allocation3]  }
0x2112   :  { %3414 = dma.done.wait [#allocation3], 32  }
0x2113   :  { %3415 = vsyncadd [#allocation3], 4294967264 }
0x2114   :  { %2743 = vsyncpa [#allocation3], 1 }

</bundles_post_ra>
